<compile_context>
chip_gen: v5e
topology: v5e:2x2
jax: 0.10.0
libtpu: 0.0.40
codegen_flags: <defaults>
</compile_context>

<pallas_src>
import math
import functools

import jax
import jax.numpy as jnp
from jax import lax
from jax.experimental import pallas as pl
from jax.experimental.pallas import tpu as pltpu


def _round_up(x, m):
    return ((x + m - 1) // m) * m


def _vmem_capacity_bytes():
    """Physical per-core VMEM in bytes; conservative fallback if the query fails."""
    try:
        cap = getattr(pltpu.get_tpu_info(), "vmem_capacity_bytes", None)
        if cap:
            return int(cap)
    except Exception:
        pass
    return 64 * 1024 * 1024  # v7x-sized conservative fallback


def _attention_kernel(q_ref, k_ref, v_ref, bias_ref,
                      wqkv_ref, bqkv_ref, wo_ref, bo_ref,
                      out_ref, av_ref,
                      q_scr, m_scr, l_scr, acc_scr,
                      *, mxu_dtype):
    """One (batch-tile, kv-tile) grid step of single-head attention.

    Grid axis 0: batch tiles ("parallel").  Grid axis 1: KV tiles
    ("arbitrary"): flash-style online softmax with m/l/acc scratch, so only a
    [Bt, Sq, Tk] score tile is ever resident in VMEM.
    """
    f32 = jnp.float32
    Bt, Sq, Dp = q_ref.shape
    Tk = k_ref.shape[1]
    kv = pl.program_id(1)

    def to_mxu(x):
        return x if mxu_dtype == f32 else x.astype(mxu_dtype)

    def proj(x_ref, idx):
        # Batch fused into the matmul M dim: one [Bt*rows, Dp] x [Dp, Dp].
        # Weights arrive pre-cast (bf16 or f32) from the wrapper.
        x2 = to_mxu(x_ref[...].reshape(-1, Dp))
        return jnp.dot(x2, wqkv_ref[idx], preferred_element_type=f32) + bqkv_ref[idx]

    @pl.when(kv == 0)
    def _init():
        # q projection once per batch tile (1/sqrt(d_k) folded into the q
        # weights/bias in the wrapper); resident across the KV loop.
        q_scr[...] = proj(q_ref, 0).reshape(Bt, Sq, Dp)
        m_scr[...] = jnp.full(m_scr.shape, -jnp.inf, f32)
        l_scr[...] = jnp.zeros(l_scr.shape, f32)
        acc_scr[...] = jnp.zeros(acc_scr.shape, f32)

    # Per-tile k/v projections (each KV row is projected exactly once).
    k_t = to_mxu(proj(k_ref, 1)).reshape(Bt, Tk, Dp)
    v_t = to_mxu(proj(v_ref, 2)).reshape(Bt, Tk, Dp)

    # Scores: batched last-dim/last-dim contraction (no k.T materialization),
    # plus the precomputed additive mask bias (0 / -1e9).
    s = lax.dot_general(to_mxu(q_scr[...]), k_t,
                        dimension_numbers=(((2,), (2,)), ((0,), (0,))),
                        preferred_element_type=f32)              # [Bt, Sq, Tk]
    s = s + bias_ref[...]

    # Online-softmax update.
    m_prev = m_scr[...]
    m_new = jnp.maximum(m_prev, jnp.max(s, axis=-1, keepdims=True))
    alpha = jnp.exp(m_prev - m_new)
    p = jnp.exp(s - m_new)
    l_scr[...] = alpha * l_scr[...] + jnp.sum(p, axis=-1, keepdims=True)
    pv = lax.dot_general(to_mxu(p), v_t,
                         dimension_numbers=(((2,), (1,)), ((0,), (0,))),
                         preferred_element_type=f32)             # [Bt, Sq, Dp]
    acc_scr[...] = alpha * acc_scr[...] + pv
    m_scr[...] = m_new

    @pl.when(kv == pl.num_programs(1) - 1)
    def _finalize():
        # Exact reciprocal (EUP); approx=True buys nothing here.
        av = acc_scr[...] * pl.reciprocal(l_scr[...], approx=False)
        av_ref[...] = av
        out = jnp.dot(to_mxu(av.reshape(-1, Dp)), wo_ref[...],
                      preferred_element_type=f32) + bo_ref[...]
        out_ref[...] = out.reshape(Bt, Sq, Dp)


def attention_pallas(q, k, v, mask, params, d_model, n_heads=1,
                     batch_block=8, kv_block=512, use_bf16_matmul=False):
    """Single-head attention forward (matches the PyTorch module).

    q: [B, Sq, D]; k, v: [B, Skv, D]; mask: [B, Skv] (nonzero == attend).
    Returns (output, attn_value), both [B, Sq, D] float32.
    """
    wq, bq, wk, bk, wv, bv, wo, bo = params
    B, Sq, D = q.shape
    Skv = k.shape[1]
    assert D == d_model and k.shape == (B, Skv, D) and v.shape == (B, Skv, D)
    assert mask.shape == (B, Skv)

    f32 = jnp.float32
    w_dtype = jnp.bfloat16 if use_bf16_matmul else f32
    mxu_dtype = jnp.bfloat16 if use_bf16_matmul else f32
    scale = 1.0 / math.sqrt(d_model / n_heads)

    # --- Padding for lane/sublane-dense layout --------------------------------
    Dp = _round_up(D, 128)                                  # lane-dense features
    Sqp = _round_up(Sq, 8)                                  # sublane-aligned q rows
    Tk = min(_round_up(kv_block, 128), _round_up(Skv, 128)) # KV tile (score lanes)
    Skvp = _round_up(Skv, Tk)
    n_kv = Skvp // Tk

    def pad3(x, rows, cols):
        return jnp.pad(x, ((0, 0), (0, rows - x.shape[1]), (0, cols - x.shape[2])))

    qp = pad3(q.astype(f32), Sqp, Dp)
    kp = pad3(k.astype(f32), Skvp, Dp)
    vp = pad3(v.astype(f32), Skvp, Dp)

    # Additive mask bias (wrapper-side): 0 where attended, -1e9 where masked or
    # padded.  Replaces the in-kernel compare+select with a single add.
    # (Fully-masked rows are ill-defined, as in the original module.)
    mask_p = jnp.pad(mask.astype(f32), ((0, 0), (0, Skvp - Skv)))
    bias = jnp.where(mask_p == 0, f32(-1e9), f32(0.0)).reshape(B, 1, Skvp)

    def pad_w(w):
        return jnp.pad(w, ((0, Dp - D), (0, Dp - D)))

    def pad_b(b):
        return jnp.pad(b.reshape(1, D), ((0, 0), (0, Dp - D)))

    # Stacked projection weights (one DMA / BlockSpec instead of three); the
    # 1/sqrt(d_k) score scale is folded into the q weights+bias (weight-side,
    # O(D^2) once in the wrapper).  Biases stay f32 (added post-matmul).
    wqkv = jnp.stack([pad_w(wq) * scale, pad_w(wk), pad_w(wv)]).astype(w_dtype)
    bqkv = jnp.stack([pad_b(bq) * scale, pad_b(bk), pad_b(bv)]).astype(f32)
    wo_p = pad_w(wo).astype(w_dtype)
    bo_p = pad_b(bo).astype(f32)

    # --- VMEM-budget-driven batch tile ----------------------------------------
    vmem_budget = min((_vmem_capacity_bytes() * 3) // 4, 100 * 1024 * 1024)
    w_bytes = 2 if use_bf16_matmul else 4

    def vmem_bytes(bt):
        blocks = (2 * bt * Sqp * Dp * 4            # q input (double-buffered)
                  + 2 * 2 * bt * Tk * Dp * 4       # k, v tiles (double-buffered)
                  + 2 * bt * 8 * Tk * 4            # mask-bias tile (sublane-padded)
                  + 2 * 2 * bt * Sqp * Dp * 4)     # out + attn_value (double-buffered)
        weights = 2 * (4 * Dp * Dp * w_bytes + 4 * 8 * Dp * 4)   # conservative (2 bufs)
        scratch = bt * Sqp * (2 * Dp + 2 * 128) * 4              # q_scr, acc, m, l
        interm = (2 * bt * Tk * Dp * 4             # projected k/v tiles
                  + 2 * bt * Sqp * Tk * 4          # scores + probs
                  + 2 * bt * Sqp * Dp * 4)         # pv / epilogue temporaries
        return blocks + weights + scratch + interm

    # Largest divisor of B that fits the budget; keep >= 2 "parallel" grid
    # steps when B >= 2 so both v7x TensorCores get work and DMA overlaps.
    bt_cap = max(1, min(batch_block, max(1, B // 2)))
    Bt = 1
    for cand in range(bt_cap, 0, -1):
        if B % cand == 0 and vmem_bytes(cand) <= (vmem_budget * 8) // 10:
            Bt = cand
            break
    num_bt = B // Bt

    kernel = functools.partial(_attention_kernel, mxu_dtype=mxu_dtype)

    def run(weight_pipeline_mode):
        def const_spec(shape):
            nd = len(shape)
            idx = lambda b, t: (0,) * nd
            if weight_pipeline_mode is None:
                return pl.BlockSpec(shape, idx)
            return pl.BlockSpec(shape, idx, pipeline_mode=weight_pipeline_mode)

        act_out_spec = pl.BlockSpec((Bt, Sqp, Dp), lambda b, t: (b, 0, 0))
        grid_spec = pltpu.PrefetchScalarGridSpec(
            num_scalar_prefetch=0,
            grid=(num_bt, n_kv),
            in_specs=[
                pl.BlockSpec((Bt, Sqp, Dp), lambda b, t: (b, 0, 0)),   # q
                pl.BlockSpec((Bt, Tk, Dp), lambda b, t: (b, t, 0)),    # k tile
                pl.BlockSpec((Bt, Tk, Dp), lambda b, t: (b, t, 0)),    # v tile
                pl.BlockSpec((Bt, 1, Tk), lambda b, t: (b, 0, t)),     # mask bias tile
                const_spec((3, Dp, Dp)),                               # wq|wk|wv (scaled wq)
                const_spec((3, 1, Dp)),                                # bq|bk|bv (scaled bq)
                const_spec((Dp, Dp)),                                  # wo
                const_spec((1, Dp)),                                   # bo
            ],
            out_specs=[act_out_spec, act_out_spec],
            scratch_shapes=[
                pltpu.VMEM((Bt, Sqp, Dp), f32),   # projected q (resident over KV loop)
                pltpu.VMEM((Bt, Sqp, 1), f32),    # running max m
                pltpu.VMEM((Bt, Sqp, 1), f32),    # running sum l
                pltpu.VMEM((Bt, Sqp, Dp), f32),   # output accumulator
            ],
        )
        return pl.pallas_call(
            kernel,
            out_shape=(jax.ShapeDtypeStruct((B, Sqp, Dp), f32),
                       jax.ShapeDtypeStruct((B, Sqp, Dp), f32)),
            grid_spec=grid_spec,
            compiler_params=pltpu.CompilerParams(
                dimension_semantics=("parallel", "arbitrary"),
                vmem_limit_bytes=int(vmem_budget)),
        )(qp, kp, vp, bias, wqkv, bqkv, wo_p, bo_p)

    try:
        # Grid-invariant weights/biases: request single buffering (no wasted
        # double buffer in VMEM -> more room for bigger batch tiles).
        out_p, av_p = run(pl.Buffered(1))
    except Exception:
        # TODO(synk): pl.Buffered(1) single-buffering rejected by this jax
        # version; fall back to default (double-buffered) weight blocks.
        out_p, av_p = run(None)

    out = out_p[:, :Sq, :D]
    attn_value = av_p[:, :Sq, :D]
    return out, attn_value


def init_params(key, d_model):
    """Deterministic init mimicking nn.Linear (uniform(-1/sqrt(in), 1/sqrt(in))).
    Weights stored as [in, out] (already transposed vs PyTorch)."""
    bound = 1.0 / math.sqrt(d_model)
    keys = jax.random.split(key, 8)

    def lin(kw, kb):
        w = jax.random.uniform(kw, (d_model, d_model), jnp.float32, -bound, bound)
        b = jax.random.uniform(kb, (d_model,), jnp.float32, -bound, bound)
        return w, b

    wq, bq = lin(keys[0], keys[1])
    wk, bk = lin(keys[2], keys[3])
    wv, bv = lin(keys[4], keys[5])
    wo, bo = lin(keys[6], keys[7])
    return (wq, bq, wk, bk, wv, bv, wo, bo)


def attention_ref(q, k, v, mask, params, d_model, n_heads=1):
    """Pure-JAX reference matching the PyTorch forward exactly."""
    wq, bq, wk, bk, wv, bv, wo, bo = params
    d_k = d_model / n_heads
    qp = q @ wq + bq
    kp = k @ wk + bk
    vp = v @ wv + bv
    attn = jnp.einsum('bqd,bkd->bqk', qp, kp) / math.sqrt(d_k)
    m = mask[:, None, :]                      # unsqueeze(1)
    attn = jnp.where(m == 0, -1e9, attn)
    attn = jax.nn.softmax(attn, axis=-1)
    av = attn @ vp
    out = av @ wo + bo
    return out, av


if __name__ == "__main__":
    B, S, d_model = 2, 8, 32
    key = jax.random.PRNGKey(0)
    kq, kk, kv_, km, kp = jax.random.split(key, 5)

    q = jax.random.normal(kq, (B, S, d_model), jnp.float32)
    k = jax.random.normal(kk, (B, S, d_model), jnp.float32)
    v = jax.random.normal(kv_, (B, S, d_model), jnp.float32)
    # binary mask [B, S]; 1 = attend, 0 = masked out.  Keep >=1 attended
    # position per row (fully-masked rows are ill-defined; see notes above).
    mask = (jax.random.uniform(km, (B, S)) > 0.25).astype(jnp.float32)
    mask = mask.at[:, 0].set(1.0)

    params = init_params(kp, d_model)

    out, attn_value = attention_pallas(q, k, v, mask, params, d_model)
    jax.block_until_ready((out, attn_value))

    out_ref, av_ref = attention_ref(q, k, v, mask, params, d_model)
    assert jnp.allclose(out, out_ref, atol=2e-3, rtol=2e-3), "output mismatch (f32)"
    assert jnp.allclose(attn_value, av_ref, atol=2e-3, rtol=2e-3), "attn_value mismatch (f32)"

    # bf16 MXU-operand path (pre-cast weights, f32 accumulation): exercise it
    # with a looser tolerance appropriate for bf16 drift.
    out_bf, av_bf = attention_pallas(q, k, v, mask, params, d_model,
                                     use_bf16_matmul=True)
    jax.block_until_ready((out_bf, av_bf))
    assert jnp.allclose(out_bf, out_ref, atol=1e-1, rtol=1e-1), "output mismatch (bf16)"
    assert jnp.allclose(av_bf, av_ref, atol=1e-1, rtol=1e-1), "attn_value mismatch (bf16)"

    print("KERNEL_OK")
</pallas_src>

<mosaic_0001>
module attributes {stable_mosaic.version = 11 : i64} {
  func.func @_attention_kernel(%arg0: i32, %arg1: i32, %arg2: memref<1x8x128xf32, #tpu.memory_space<vmem>>, %arg3: memref<1x128x128xf32, #tpu.memory_space<vmem>>, %arg4: memref<1x128x128xf32, #tpu.memory_space<vmem>>, %arg5: memref<1x1x128xf32, #tpu.memory_space<vmem>>, %arg6: memref<3x128x128xf32, #tpu.memory_space<vmem>>, %arg7: memref<3x1x128xf32, #tpu.memory_space<vmem>>, %arg8: memref<128x128xf32, #tpu.memory_space<vmem>>, %arg9: memref<1x128xf32, #tpu.memory_space<vmem>>, %arg10: memref<1x8x128xf32, #tpu.memory_space<vmem>>, %arg11: memref<1x8x128xf32, #tpu.memory_space<vmem>>, %arg12: memref<1x8x128xf32, #tpu.memory_space<vmem>>, %arg13: memref<1x8x1xf32, #tpu.memory_space<vmem>>, %arg14: memref<1x8x1xf32, #tpu.memory_space<vmem>>, %arg15: memref<1x8x128xf32, #tpu.memory_space<vmem>>) attributes {dimension_semantics = [#tpu.dimension_semantics<parallel>, #tpu.dimension_semantics<arbitrary>], iteration_bounds = array<i64: 2, 1>, scalar_prefetch = 0 : i64, scratch_operands = 4 : i64, tpu.core_type = #tpu.core_type<tc>, window_params = [{transform_indices = @transform_0, window_bounds = array<i64: 1, 8, 128>}, {transform_indices = @transform_1, window_bounds = array<i64: 1, 128, 128>}, {transform_indices = @transform_2, window_bounds = array<i64: 1, 128, 128>}, {transform_indices = @transform_3, window_bounds = array<i64: 1, 1, 128>}, {pipeline_mode = #tpu.pipeline_mode<synchronous>, transform_indices = @transform_4, window_bounds = array<i64: 3, 128, 128>}, {pipeline_mode = #tpu.pipeline_mode<synchronous>, transform_indices = @transform_5, window_bounds = array<i64: 3, 1, 128>}, {pipeline_mode = #tpu.pipeline_mode<synchronous>, transform_indices = @transform_6, window_bounds = array<i64: 128, 128>}, {pipeline_mode = #tpu.pipeline_mode<synchronous>, transform_indices = @transform_7, window_bounds = array<i64: 1, 128>}, {transform_indices = @transform_8, window_bounds = array<i64: 1, 8, 128>}, {transform_indices = @transform_9, window_bounds = array<i64: 1, 8, 128>}]} {
    %c0_i32 = arith.constant 0 : i32
    %0 = arith.cmpi eq, %arg1, %c0_i32 : i32
    %1 = arith.extui %0 : i1 to i32
    %c0_i32_0 = arith.constant 0 : i32
    %2 = arith.cmpi ne, %1, %c0_i32_0 : i32
    scf.if %2 {
      %c0_47 = arith.constant 0 : index
      %c0_48 = arith.constant 0 : index
      %c0_49 = arith.constant 0 : index
      %53 = vector.load %arg2[%c0_47, %c0_48, %c0_49] : memref<1x8x128xf32, #tpu.memory_space<vmem>>, vector<1x8x128xf32>
      %54 = vector.shape_cast %53 : vector<1x8x128xf32> to vector<8x128xf32>
      %c0_50 = arith.constant 0 : index
      %c0_51 = arith.constant 0 : index
      %c0_52 = arith.constant 0 : index
      %55 = vector.load %arg6[%c0_50, %c0_51, %c0_52] : memref<3x128x128xf32, #tpu.memory_space<vmem>>, vector<1x128x128xf32>
      %56 = vector.shape_cast %55 : vector<1x128x128xf32> to vector<128x128xf32>
      %cst_53 = arith.constant dense<0.000000e+00> : vector<8x128xf32>
      %57 = tpu.matmul %54, %56, %cst_53 {dimension_numbers = #tpu.dot_dimension_numbers<[1], [0], [0], [1], [0, 0, 1, 1], [], []>} : vector<8x128xf32>, vector<128x128xf32>, vector<8x128xf32> -> vector<8x128xf32>
      %c0_54 = arith.constant 0 : index
      %c0_55 = arith.constant 0 : index
      %c0_56 = arith.constant 0 : index
      %58 = vector.load %arg7[%c0_54, %c0_55, %c0_56] : memref<3x1x128xf32, #tpu.memory_space<vmem>>, vector<1x1x128xf32>
      %59 = vector.shape_cast %58 : vector<1x1x128xf32> to vector<1x128xf32>
      %60 = vector.broadcast %59 : vector<1x128xf32> to vector<8x128xf32>
      %61 = arith.addf %57, %60 : vector<8x128xf32>
      %62 = vector.shape_cast %61 : vector<8x128xf32> to vector<1x8x128xf32>
      %c0_57 = arith.constant 0 : index
      %c0_58 = arith.constant 0 : index
      %c0_59 = arith.constant 0 : index
      %63 = vector.load %arg12[%c0_57, %c0_58, %c0_59] : memref<1x8x128xf32, #tpu.memory_space<vmem>>, vector<1x8x128xf32>
      tpu.vector_store %arg12[%c0_57, %c0_58, %c0_59], %62 {strides = array<i32>} : memref<1x8x128xf32, #tpu.memory_space<vmem>>, vector<1x8x128xf32>,
      %cst_60 = arith.constant 0xFF800000 : f32
      %64 = vector.broadcast %cst_60 : f32 to vector<1x8x1xf32>
      %c0_61 = arith.constant 0 : index
      %c0_62 = arith.constant 0 : index
      %c0_63 = arith.constant 0 : index
      %65 = vector.load %arg13[%c0_61, %c0_62, %c0_63] : memref<1x8x1xf32, #tpu.memory_space<vmem>>, vector<1x8x1xf32>
      tpu.vector_store %arg13[%c0_61, %c0_62, %c0_63], %64 {strides = array<i32>} : memref<1x8x1xf32, #tpu.memory_space<vmem>>, vector<1x8x1xf32>,
      %cst_64 = arith.constant 0.000000e+00 : f32
      %66 = vector.broadcast %cst_64 : f32 to vector<1x8x1xf32>
      %c0_65 = arith.constant 0 : index
      %c0_66 = arith.constant 0 : index
      %c0_67 = arith.constant 0 : index
      %67 = vector.load %arg14[%c0_65, %c0_66, %c0_67] : memref<1x8x1xf32, #tpu.memory_space<vmem>>, vector<1x8x1xf32>
      tpu.vector_store %arg14[%c0_65, %c0_66, %c0_67], %66 {strides = array<i32>} : memref<1x8x1xf32, #tpu.memory_space<vmem>>, vector<1x8x1xf32>,
      %cst_68 = arith.constant 0.000000e+00 : f32
      %68 = vector.broadcast %cst_68 : f32 to vector<1x8x128xf32>
      %c0_69 = arith.constant 0 : index
      %c0_70 = arith.constant 0 : index
      %c0_71 = arith.constant 0 : index
      %69 = vector.load %arg15[%c0_69, %c0_70, %c0_71] : memref<1x8x128xf32, #tpu.memory_space<vmem>>, vector<1x8x128xf32>
      tpu.vector_store %arg15[%c0_69, %c0_70, %c0_71], %68 {strides = array<i32>} : memref<1x8x128xf32, #tpu.memory_space<vmem>>, vector<1x8x128xf32>,
    } else {
    }
    %c0 = arith.constant 0 : index
    %c0_1 = arith.constant 0 : index
    %c0_2 = arith.constant 0 : index
    %3 = vector.load %arg3[%c0, %c0_1, %c0_2] : memref<1x128x128xf32, #tpu.memory_space<vmem>>, vector<1x128x128xf32>
    %4 = vector.shape_cast %3 : vector<1x128x128xf32> to vector<128x128xf32>
    %c1 = arith.constant 1 : index
    %c0_3 = arith.constant 0 : index
    %c0_4 = arith.constant 0 : index
    %5 = vector.load %arg6[%c1, %c0_3, %c0_4] : memref<3x128x128xf32, #tpu.memory_space<vmem>>, vector<1x128x128xf32>
    %6 = vector.shape_cast %5 : vector<1x128x128xf32> to vector<128x128xf32>
    %cst = arith.constant dense<0.000000e+00> : vector<128x128xf32>
    %7 = tpu.matmul %4, %6, %cst {dimension_numbers = #tpu.dot_dimension_numbers<[1], [0], [0], [1], [0, 0, 1, 1], [], []>} : vector<128x128xf32>, vector<128x128xf32>, vector<128x128xf32> -> vector<128x128xf32>
    %c1_5 = arith.constant 1 : index
    %c0_6 = arith.constant 0 : index
    %c0_7 = arith.constant 0 : index
    %8 = vector.load %arg7[%c1_5, %c0_6, %c0_7] : memref<3x1x128xf32, #tpu.memory_space<vmem>>, vector<1x1x128xf32>
    %9 = vector.shape_cast %8 : vector<1x1x128xf32> to vector<1x128xf32>
    %10 = vector.broadcast %9 : vector<1x128xf32> to vector<128x128xf32>
    %11 = arith.addf %7, %10 : vector<128x128xf32>
    %12 = vector.shape_cast %11 : vector<128x128xf32> to vector<1x128x128xf32>
    %c0_8 = arith.constant 0 : index
    %c0_9 = arith.constant 0 : index
    %c0_10 = arith.constant 0 : index
    %13 = vector.load %arg4[%c0_8, %c0_9, %c0_10] : memref<1x128x128xf32, #tpu.memory_space<vmem>>, vector<1x128x128xf32>
    %14 = vector.shape_cast %13 : vector<1x128x128xf32> to vector<128x128xf32>
    %c2 = arith.constant 2 : index
    %c0_11 = arith.constant 0 : index
    %c0_12 = arith.constant 0 : index
    %15 = vector.load %arg6[%c2, %c0_11, %c0_12] : memref<3x128x128xf32, #tpu.memory_space<vmem>>, vector<1x128x128xf32>
    %16 = vector.shape_cast %15 : vector<1x128x128xf32> to vector<128x128xf32>
    %cst_13 = arith.constant dense<0.000000e+00> : vector<128x128xf32>
    %17 = tpu.matmul %14, %16, %cst_13 {dimension_numbers = #tpu.dot_dimension_numbers<[1], [0], [0], [1], [0, 0, 1, 1], [], []>} : vector<128x128xf32>, vector<128x128xf32>, vector<128x128xf32> -> vector<128x128xf32>
    %c2_14 = arith.constant 2 : index
    %c0_15 = arith.constant 0 : index
    %c0_16 = arith.constant 0 : index
    %18 = vector.load %arg7[%c2_14, %c0_15, %c0_16] : memref<3x1x128xf32, #tpu.memory_space<vmem>>, vector<1x1x128xf32>
    %19 = vector.shape_cast %18 : vector<1x1x128xf32> to vector<1x128xf32>
    %20 = vector.broadcast %19 : vector<1x128xf32> to vector<128x128xf32>
    %21 = arith.addf %17, %20 : vector<128x128xf32>
    %22 = vector.shape_cast %21 : vector<128x128xf32> to vector<1x128x128xf32>
    %c0_17 = arith.constant 0 : index
    %c0_18 = arith.constant 0 : index
    %c0_19 = arith.constant 0 : index
    %23 = vector.load %arg12[%c0_17, %c0_18, %c0_19] : memref<1x8x128xf32, #tpu.memory_space<vmem>>, vector<1x8x128xf32>
    %cst_20 = arith.constant dense<0.000000e+00> : vector<1x8x128xf32>
    %24 = tpu.matmul %23, %12, %cst_20 {dimension_numbers = #tpu.dot_dimension_numbers<[2], [2], [1], [1], [0, 0, 0, 1, 1, 1], [0], [0]>} : vector<1x8x128xf32>, vector<1x128x128xf32>, vector<1x8x128xf32> -> vector<1x8x128xf32>
    %c0_21 = arith.constant 0 : index
    %c0_22 = arith.constant 0 : index
    %c0_23 = arith.constant 0 : index
    %25 = vector.load %arg5[%c0_21, %c0_22, %c0_23] : memref<1x1x128xf32, #tpu.memory_space<vmem>>, vector<1x1x128xf32>
    %26 = vector.broadcast %25 : vector<1x1x128xf32> to vector<1x8x128xf32>
    %27 = arith.addf %24, %26 : vector<1x8x128xf32>
    %c0_24 = arith.constant 0 : index
    %c0_25 = arith.constant 0 : index
    %c0_26 = arith.constant 0 : index
    %28 = vector.load %arg13[%c0_24, %c0_25, %c0_26] : memref<1x8x1xf32, #tpu.memory_space<vmem>>, vector<1x8x1xf32>
    %cst_27 = arith.constant dense<0xFF800000> : vector<1x8xf32>
    %29 = vector.multi_reduction <maximumf>, %27, %cst_27 [2] : vector<1x8x128xf32> to vector<1x8xf32>
    %30 = vector.shape_cast %29 : vector<1x8xf32> to vector<1x8x1xf32>
    %31 = arith.maximumf %28, %30 : vector<1x8x1xf32>
    %32 = arith.subf %28, %31 : vector<1x8x1xf32>
    %33 = math.exp %32 : vector<1x8x1xf32>
    %34 = vector.broadcast %31 : vector<1x8x1xf32> to vector<1x8x128xf32>
    %35 = arith.subf %27, %34 : vector<1x8x128xf32>
    %36 = math.exp %35 : vector<1x8x128xf32>
    %c0_28 = arith.constant 0 : index
    %c0_29 = arith.constant 0 : index
    %c0_30 = arith.constant 0 : index
    %37 = vector.load %arg14[%c0_28, %c0_29, %c0_30] : memref<1x8x1xf32, #tpu.memory_space<vmem>>, vector<1x8x1xf32>
    %38 = arith.mulf %33, %37 : vector<1x8x1xf32>
    %cst_31 = arith.constant dense<0.000000e+00> : vector<1x8xf32>
    %39 = vector.multi_reduction <add>, %36, %cst_31 [2] : vector<1x8x128xf32> to vector<1x8xf32>
    %40 = vector.shape_cast %39 : vector<1x8xf32> to vector<1x8x1xf32>
    %41 = arith.addf %38, %40 : vector<1x8x1xf32>
    %c0_32 = arith.constant 0 : index
    %c0_33 = arith.constant 0 : index
    %c0_34 = arith.constant 0 : index
    %42 = vector.load %arg14[%c0_32, %c0_33, %c0_34] : memref<1x8x1xf32, #tpu.memory_space<vmem>>, vector<1x8x1xf32>
    tpu.vector_store %arg14[%c0_32, %c0_33, %c0_34], %41 {strides = array<i32>} : memref<1x8x1xf32, #tpu.memory_space<vmem>>, vector<1x8x1xf32>,
    %cst_35 = arith.constant dense<0.000000e+00> : vector<1x8x128xf32>
    %43 = tpu.matmul %36, %22, %cst_35 {dimension_numbers = #tpu.dot_dimension_numbers<[2], [1], [1], [2], [0, 0, 0, 1, 1, 2], [0], [0]>} : vector<1x8x128xf32>, vector<1x128x128xf32>, vector<1x8x128xf32> -> vector<1x8x128xf32>
    %c0_36 = arith.constant 0 : index
    %c0_37 = arith.constant 0 : index
    %c0_38 = arith.constant 0 : index
    %44 = vector.load %arg15[%c0_36, %c0_37, %c0_38] : memref<1x8x128xf32, #tpu.memory_space<vmem>>, vector<1x8x128xf32>
    %45 = vector.broadcast %33 : vector<1x8x1xf32> to vector<1x8x128xf32>
    %46 = arith.mulf %45, %44 : vector<1x8x128xf32>
    %47 = arith.addf %46, %43 : vector<1x8x128xf32>
    %c0_39 = arith.constant 0 : index
    %c0_40 = arith.constant 0 : index
    %c0_41 = arith.constant 0 : index
    %48 = vector.load %arg15[%c0_39, %c0_40, %c0_41] : memref<1x8x128xf32, #tpu.memory_space<vmem>>, vector<1x8x128xf32>
    tpu.vector_store %arg15[%c0_39, %c0_40, %c0_41], %47 {strides = array<i32>} : memref<1x8x128xf32, #tpu.memory_space<vmem>>, vector<1x8x128xf32>,
    %c0_42 = arith.constant 0 : index
    %c0_43 = arith.constant 0 : index
    %c0_44 = arith.constant 0 : index
    %49 = vector.load %arg13[%c0_42, %c0_43, %c0_44] : memref<1x8x1xf32, #tpu.memory_space<vmem>>, vector<1x8x1xf32>
    tpu.vector_store %arg13[%c0_42, %c0_43, %c0_44], %31 {strides = array<i32>} : memref<1x8x1xf32, #tpu.memory_space<vmem>>, vector<1x8x1xf32>,
    %c0_i32_45 = arith.constant 0 : i32
    %50 = arith.cmpi eq, %arg1, %c0_i32_45 : i32
    %51 = arith.extui %50 : i1 to i32
    %c0_i32_46 = arith.constant 0 : i32
    %52 = arith.cmpi ne, %51, %c0_i32_46 : i32
    scf.if %52 {
      %c0_47 = arith.constant 0 : index
      %c0_48 = arith.constant 0 : index
      %c0_49 = arith.constant 0 : index
      %53 = vector.load %arg15[%c0_47, %c0_48, %c0_49] : memref<1x8x128xf32, #tpu.memory_space<vmem>>, vector<1x8x128xf32>
      %c0_50 = arith.constant 0 : index
      %c0_51 = arith.constant 0 : index
      %c0_52 = arith.constant 0 : index
      %54 = vector.load %arg14[%c0_50, %c0_51, %c0_52] : memref<1x8x1xf32, #tpu.memory_space<vmem>>, vector<1x8x1xf32>
      %55 = tpu.reciprocal %54 : vector<1x8x1xf32> -> vector<1x8x1xf32>
      %56 = vector.broadcast %55 : vector<1x8x1xf32> to vector<1x8x128xf32>
      %57 = arith.mulf %53, %56 : vector<1x8x128xf32>
      %c0_53 = arith.constant 0 : index
      %c0_54 = arith.constant 0 : index
      %c0_55 = arith.constant 0 : index
      %58 = vector.load %arg11[%c0_53, %c0_54, %c0_55] : memref<1x8x128xf32, #tpu.memory_space<vmem>>, vector<1x8x128xf32>
      tpu.vector_store %arg11[%c0_53, %c0_54, %c0_55], %57 {strides = array<i32>} : memref<1x8x128xf32, #tpu.memory_space<vmem>>, vector<1x8x128xf32>,
      %59 = vector.shape_cast %57 : vector<1x8x128xf32> to vector<8x128xf32>
      %c0_56 = arith.constant 0 : index
      %c0_57 = arith.constant 0 : index
      %60 = vector.load %arg8[%c0_56, %c0_57] : memref<128x128xf32, #tpu.memory_space<vmem>>, vector<128x128xf32>
      %cst_58 = arith.constant dense<0.000000e+00> : vector<8x128xf32>
      %61 = tpu.matmul %59, %60, %cst_58 {dimension_numbers = #tpu.dot_dimension_numbers<[1], [0], [0], [1], [0, 0, 1, 1], [], []>} : vector<8x128xf32>, vector<128x128xf32>, vector<8x128xf32> -> vector<8x128xf32>
      %c0_59 = arith.constant 0 : index
      %c0_60 = arith.constant 0 : index
      %62 = vector.load %arg9[%c0_59, %c0_60] : memref<1x128xf32, #tpu.memory_space<vmem>>, vector<1x128xf32>
      %63 = vector.broadcast %62 : vector<1x128xf32> to vector<8x128xf32>
      %64 = arith.addf %61, %63 : vector<8x128xf32>
      %65 = vector.shape_cast %64 : vector<8x128xf32> to vector<1x8x128xf32>
      %c0_61 = arith.constant 0 : index
      %c0_62 = arith.constant 0 : index
      %c0_63 = arith.constant 0 : index
      %66 = vector.load %arg10[%c0_61, %c0_62, %c0_63] : memref<1x8x128xf32, #tpu.memory_space<vmem>>, vector<1x8x128xf32>
      tpu.vector_store %arg10[%c0_61, %c0_62, %c0_63], %65 {strides = array<i32>} : memref<1x8x128xf32, #tpu.memory_space<vmem>>, vector<1x8x128xf32>,
    } else {
    }
    return
  }
  func.func @transform_0(%arg0: i32, %arg1: i32) -> (i32, i32, i32) {
    %c0_i32 = arith.constant 0 : i32
    %c0_i32_0 = arith.constant 0 : i32
    %c0_i32_1 = arith.constant 0 : i32
    return %arg0, %c0_i32, %c0_i32_0 : i32, i32, i32
  }
  func.func @transform_1(%arg0: i32, %arg1: i32) -> (i32, i32, i32) {
    %c0_i32 = arith.constant 0 : i32
    %c0_i32_0 = arith.constant 0 : i32
    return %arg0, %arg1, %c0_i32 : i32, i32, i32
  }
  func.func @transform_2(%arg0: i32, %arg1: i32) -> (i32, i32, i32) {
    %c0_i32 = arith.constant 0 : i32
    %c0_i32_0 = arith.constant 0 : i32
    return %arg0, %arg1, %c0_i32 : i32, i32, i32
  }
  func.func @transform_3(%arg0: i32, %arg1: i32) -> (i32, i32, i32) {
    %c0_i32 = arith.constant 0 : i32
    %c0_i32_0 = arith.constant 0 : i32
    return %arg0, %c0_i32, %arg1 : i32, i32, i32
  }
  func.func @transform_4(%arg0: i32, %arg1: i32) -> (i32, i32, i32) {
    %c0_i32 = arith.constant 0 : i32
    %c0_i32_0 = arith.constant 0 : i32
    %c0_i32_1 = arith.constant 0 : i32
    %c0_i32_2 = arith.constant 0 : i32
    return %c0_i32, %c0_i32_0, %c0_i32_1 : i32, i32, i32
  }
  func.func @transform_5(%arg0: i32, %arg1: i32) -> (i32, i32, i32) {
    %c0_i32 = arith.constant 0 : i32
    %c0_i32_0 = arith.constant 0 : i32
    %c0_i32_1 = arith.constant 0 : i32
    %c0_i32_2 = arith.constant 0 : i32
    return %c0_i32, %c0_i32_0, %c0_i32_1 : i32, i32, i32
  }
  func.func @transform_6(%arg0: i32, %arg1: i32) -> (i32, i32) {
    %c0_i32 = arith.constant 0 : i32
    %c0_i32_0 = arith.constant 0 : i32
    %c0_i32_1 = arith.constant 0 : i32
    return %c0_i32, %c0_i32_0 : i32, i32
  }
  func.func @transform_7(%arg0: i32, %arg1: i32) -> (i32, i32) {
    %c0_i32 = arith.constant 0 : i32
    %c0_i32_0 = arith.constant 0 : i32
    %c0_i32_1 = arith.constant 0 : i32
    return %c0_i32, %c0_i32_0 : i32, i32
  }
  func.func @transform_8(%arg0: i32, %arg1: i32) -> (i32, i32, i32) {
    %c0_i32 = arith.constant 0 : i32
    %c0_i32_0 = arith.constant 0 : i32
    %c0_i32_1 = arith.constant 0 : i32
    return %arg0, %c0_i32, %c0_i32_0 : i32, i32, i32
  }
  func.func @transform_9(%arg0: i32, %arg1: i32) -> (i32, i32, i32) {
    %c0_i32 = arith.constant 0 : i32
    %c0_i32_0 = arith.constant 0 : i32
    %c0_i32_1 = arith.constant 0 : i32
    return %arg0, %c0_i32, %c0_i32_0 : i32, i32, i32
  }
}

module attributes {stable_mosaic.version = 11 : i64} {
  func.func @_attention_kernel(%arg0: i32, %arg1: i32, %arg2: memref<1x8x128xf32, #tpu.memory_space<vmem>>, %arg3: memref<1x128x128xf32, #tpu.memory_space<vmem>>, %arg4: memref<1x128x128xf32, #tpu.memory_space<vmem>>, %arg5: memref<1x1x128xf32, #tpu.memory_space<vmem>>, %arg6: memref<3x128x128xf32, #tpu.memory_space<vmem>>, %arg7: memref<3x1x128xf32, #tpu.memory_space<vmem>>, %arg8: memref<128x128xf32, #tpu.memory_space<vmem>>, %arg9: memref<1x128xf32, #tpu.memory_space<vmem>>, %arg10: memref<1x8x128xf32, #tpu.memory_space<vmem>>, %arg11: memref<1x8x128xf32, #tpu.memory_space<vmem>>, %arg12: memref<1x8x128xf32, #tpu.memory_space<vmem>>, %arg13: memref<1x8x1xf32, #tpu.memory_space<vmem>>, %arg14: memref<1x8x1xf32, #tpu.memory_space<vmem>>, %arg15: memref<1x8x128xf32, #tpu.memory_space<vmem>>) attributes {dimension_semantics = [#tpu.dimension_semantics<parallel>, #tpu.dimension_semantics<arbitrary>], iteration_bounds = array<i64: 2, 1>, scalar_prefetch = 0 : i64, scratch_operands = 4 : i64, tpu.core_type = #tpu.core_type<tc>, window_params = [{transform_indices = @transform_0, window_bounds = array<i64: 1, 8, 128>}, {transform_indices = @transform_1, window_bounds = array<i64: 1, 128, 128>}, {transform_indices = @transform_2, window_bounds = array<i64: 1, 128, 128>}, {transform_indices = @transform_3, window_bounds = array<i64: 1, 1, 128>}, {pipeline_mode = #tpu.pipeline_mode<synchronous>, transform_indices = @transform_4, window_bounds = array<i64: 3, 128, 128>}, {pipeline_mode = #tpu.pipeline_mode<synchronous>, transform_indices = @transform_5, window_bounds = array<i64: 3, 1, 128>}, {pipeline_mode = #tpu.pipeline_mode<synchronous>, transform_indices = @transform_6, window_bounds = array<i64: 128, 128>}, {pipeline_mode = #tpu.pipeline_mode<synchronous>, transform_indices = @transform_7, window_bounds = array<i64: 1, 128>}, {transform_indices = @transform_8, window_bounds = array<i64: 1, 8, 128>}, {transform_indices = @transform_9, window_bounds = array<i64: 1, 8, 128>}]} {
    %c0_i32 = arith.constant 0 : i32
    %0 = arith.cmpi eq, %arg1, %c0_i32 : i32
    %1 = arith.extui %0 : i1 to i32
    %c0_i32_0 = arith.constant 0 : i32
    %2 = arith.cmpi ne, %1, %c0_i32_0 : i32
    scf.if %2 {
      %c0_47 = arith.constant 0 : index
      %c0_48 = arith.constant 0 : index
      %c0_49 = arith.constant 0 : index
      %53 = vector.load %arg2[%c0_47, %c0_48, %c0_49] : memref<1x8x128xf32, #tpu.memory_space<vmem>>, vector<1x8x128xf32>
      %54 = vector.shape_cast %53 : vector<1x8x128xf32> to vector<8x128xf32>
      %c0_50 = arith.constant 0 : index
      %c0_51 = arith.constant 0 : index
      %c0_52 = arith.constant 0 : index
      %55 = vector.load %arg6[%c0_50, %c0_51, %c0_52] : memref<3x128x128xf32, #tpu.memory_space<vmem>>, vector<1x128x128xf32>
      %56 = vector.shape_cast %55 : vector<1x128x128xf32> to vector<128x128xf32>
      %cst_53 = arith.constant dense<0.000000e+00> : vector<8x128xf32>
      %57 = tpu.matmul %54, %56, %cst_53 {dimension_numbers = #tpu.dot_dimension_numbers<[1], [0], [0], [1], [0, 0, 1, 1], [], []>} : vector<8x128xf32>, vector<128x128xf32>, vector<8x128xf32> -> vector<8x128xf32>
      %c0_54 = arith.constant 0 : index
      %c0_55 = arith.constant 0 : index
      %c0_56 = arith.constant 0 : index
      %58 = vector.load %arg7[%c0_54, %c0_55, %c0_56] : memref<3x1x128xf32, #tpu.memory_space<vmem>>, vector<1x1x128xf32>
      %59 = vector.shape_cast %58 : vector<1x1x128xf32> to vector<1x128xf32>
      %60 = vector.broadcast %59 : vector<1x128xf32> to vector<8x128xf32>
      %61 = arith.addf %57, %60 : vector<8x128xf32>
      %62 = vector.shape_cast %61 : vector<8x128xf32> to vector<1x8x128xf32>
      %c0_57 = arith.constant 0 : index
      %c0_58 = arith.constant 0 : index
      %c0_59 = arith.constant 0 : index
      %63 = vector.load %arg12[%c0_57, %c0_58, %c0_59] : memref<1x8x128xf32, #tpu.memory_space<vmem>>, vector<1x8x128xf32>
      tpu.vector_store %arg12[%c0_57, %c0_58, %c0_59], %62 {strides = array<i32>} : memref<1x8x128xf32, #tpu.memory_space<vmem>>, vector<1x8x128xf32>,
      %cst_60 = arith.constant 0xFF800000 : f32
      %64 = vector.broadcast %cst_60 : f32 to vector<1x8x1xf32>
      %c0_61 = arith.constant 0 : index
      %c0_62 = arith.constant 0 : index
      %c0_63 = arith.constant 0 : index
      %65 = vector.load %arg13[%c0_61, %c0_62, %c0_63] : memref<1x8x1xf32, #tpu.memory_space<vmem>>, vector<1x8x1xf32>
      tpu.vector_store %arg13[%c0_61, %c0_62, %c0_63], %64 {strides = array<i32>} : memref<1x8x1xf32, #tpu.memory_space<vmem>>, vector<1x8x1xf32>,
      %cst_64 = arith.constant 0.000000e+00 : f32
      %66 = vector.broadcast %cst_64 : f32 to vector<1x8x1xf32>
      %c0_65 = arith.constant 0 : index
      %c0_66 = arith.constant 0 : index
      %c0_67 = arith.constant 0 : index
      %67 = vector.load %arg14[%c0_65, %c0_66, %c0_67] : memref<1x8x1xf32, #tpu.memory_space<vmem>>, vector<1x8x1xf32>
      tpu.vector_store %arg14[%c0_65, %c0_66, %c0_67], %66 {strides = array<i32>} : memref<1x8x1xf32, #tpu.memory_space<vmem>>, vector<1x8x1xf32>,
      %cst_68 = arith.constant 0.000000e+00 : f32
      %68 = vector.broadcast %cst_68 : f32 to vector<1x8x128xf32>
      %c0_69 = arith.constant 0 : index
      %c0_70 = arith.constant 0 : index
      %c0_71 = arith.constant 0 : index
      %69 = vector.load %arg15[%c0_69, %c0_70, %c0_71] : memref<1x8x128xf32, #tpu.memory_space<vmem>>, vector<1x8x128xf32>
      tpu.vector_store %arg15[%c0_69, %c0_70, %c0_71], %68 {strides = array<i32>} : memref<1x8x128xf32, #tpu.memory_space<vmem>>, vector<1x8x128xf32>,
    } else {
    }
    %c0 = arith.constant 0 : index
    %c0_1 = arith.constant 0 : index
    %c0_2 = arith.constant 0 : index
    %3 = vector.load %arg3[%c0, %c0_1, %c0_2] : memref<1x128x128xf32, #tpu.memory_space<vmem>>, vector<1x128x128xf32>
    %4 = vector.shape_cast %3 : vector<1x128x128xf32> to vector<128x128xf32>
    %c1 = arith.constant 1 : index
    %c0_3 = arith.constant 0 : index
    %c0_4 = arith.constant 0 : index
    %5 = vector.load %arg6[%c1, %c0_3, %c0_4] : memref<3x128x128xf32, #tpu.memory_space<vmem>>, vector<1x128x128xf32>
    %6 = vector.shape_cast %5 : vector<1x128x128xf32> to vector<128x128xf32>
    %cst = arith.constant dense<0.000000e+00> : vector<128x128xf32>
    %7 = tpu.matmul %4, %6, %cst {dimension_numbers = #tpu.dot_dimension_numbers<[1], [0], [0], [1], [0, 0, 1, 1], [], []>} : vector<128x128xf32>, vector<128x128xf32>, vector<128x128xf32> -> vector<128x128xf32>
    %c1_5 = arith.constant 1 : index
    %c0_6 = arith.constant 0 : index
    %c0_7 = arith.constant 0 : index
    %8 = vector.load %arg7[%c1_5, %c0_6, %c0_7] : memref<3x1x128xf32, #tpu.memory_space<vmem>>, vector<1x1x128xf32>
    %9 = vector.shape_cast %8 : vector<1x1x128xf32> to vector<1x128xf32>
    %10 = vector.broadcast %9 : vector<1x128xf32> to vector<128x128xf32>
    %11 = arith.addf %7, %10 : vector<128x128xf32>
    %12 = vector.shape_cast %11 : vector<128x128xf32> to vector<1x128x128xf32>
    %c0_8 = arith.constant 0 : index
    %c0_9 = arith.constant 0 : index
    %c0_10 = arith.constant 0 : index
    %13 = vector.load %arg4[%c0_8, %c0_9, %c0_10] : memref<1x128x128xf32, #tpu.memory_space<vmem>>, vector<1x128x128xf32>
    %14 = vector.shape_cast %13 : vector<1x128x128xf32> to vector<128x128xf32>
    %c2 = arith.constant 2 : index
    %c0_11 = arith.constant 0 : index
    %c0_12 = arith.constant 0 : index
    %15 = vector.load %arg6[%c2, %c0_11, %c0_12] : memref<3x128x128xf32, #tpu.memory_space<vmem>>, vector<1x128x128xf32>
    %16 = vector.shape_cast %15 : vector<1x128x128xf32> to vector<128x128xf32>
    %cst_13 = arith.constant dense<0.000000e+00> : vector<128x128xf32>
    %17 = tpu.matmul %14, %16, %cst_13 {dimension_numbers = #tpu.dot_dimension_numbers<[1], [0], [0], [1], [0, 0, 1, 1], [], []>} : vector<128x128xf32>, vector<128x128xf32>, vector<128x128xf32> -> vector<128x128xf32>
    %c2_14 = arith.constant 2 : index
    %c0_15 = arith.constant 0 : index
    %c0_16 = arith.constant 0 : index
    %18 = vector.load %arg7[%c2_14, %c0_15, %c0_16] : memref<3x1x128xf32, #tpu.memory_space<vmem>>, vector<1x1x128xf32>
    %19 = vector.shape_cast %18 : vector<1x1x128xf32> to vector<1x128xf32>
    %20 = vector.broadcast %19 : vector<1x128xf32> to vector<128x128xf32>
    %21 = arith.addf %17, %20 : vector<128x128xf32>
    %22 = vector.shape_cast %21 : vector<128x128xf32> to vector<1x128x128xf32>
    %c0_17 = arith.constant 0 : index
    %c0_18 = arith.constant 0 : index
    %c0_19 = arith.constant 0 : index
    %23 = vector.load %arg12[%c0_17, %c0_18, %c0_19] : memref<1x8x128xf32, #tpu.memory_space<vmem>>, vector<1x8x128xf32>
    %cst_20 = arith.constant dense<0.000000e+00> : vector<1x8x128xf32>
    %24 = tpu.matmul %23, %12, %cst_20 {dimension_numbers = #tpu.dot_dimension_numbers<[2], [2], [1], [1], [0, 0, 0, 1, 1, 1], [0], [0]>} : vector<1x8x128xf32>, vector<1x128x128xf32>, vector<1x8x128xf32> -> vector<1x8x128xf32>
    %c0_21 = arith.constant 0 : index
    %c0_22 = arith.constant 0 : index
    %c0_23 = arith.constant 0 : index
    %25 = vector.load %arg5[%c0_21, %c0_22, %c0_23] : memref<1x1x128xf32, #tpu.memory_space<vmem>>, vector<1x1x128xf32>
    %26 = vector.broadcast %25 : vector<1x1x128xf32> to vector<1x8x128xf32>
    %27 = arith.addf %24, %26 : vector<1x8x128xf32>
    %c0_24 = arith.constant 0 : index
    %c0_25 = arith.constant 0 : index
    %c0_26 = arith.constant 0 : index
    %28 = vector.load %arg13[%c0_24, %c0_25, %c0_26] : memref<1x8x1xf32, #tpu.memory_space<vmem>>, vector<1x8x1xf32>
    %cst_27 = arith.constant dense<0xFF800000> : vector<1x8xf32>
    %29 = vector.multi_reduction <maximumf>, %27, %cst_27 [2] : vector<1x8x128xf32> to vector<1x8xf32>
    %30 = vector.shape_cast %29 : vector<1x8xf32> to vector<1x8x1xf32>
    %31 = arith.maximumf %28, %30 : vector<1x8x1xf32>
    %32 = arith.subf %28, %31 : vector<1x8x1xf32>
    %33 = math.exp %32 : vector<1x8x1xf32>
    %34 = vector.broadcast %31 : vector<1x8x1xf32> to vector<1x8x128xf32>
    %35 = arith.subf %27, %34 : vector<1x8x128xf32>
    %36 = math.exp %35 : vector<1x8x128xf32>
    %c0_28 = arith.constant 0 : index
    %c0_29 = arith.constant 0 : index
    %c0_30 = arith.constant 0 : index
    %37 = vector.load %arg14[%c0_28, %c0_29, %c0_30] : memref<1x8x1xf32, #tpu.memory_space<vmem>>, vector<1x8x1xf32>
    %38 = arith.mulf %33, %37 : vector<1x8x1xf32>
    %cst_31 = arith.constant dense<0.000000e+00> : vector<1x8xf32>
    %39 = vector.multi_reduction <add>, %36, %cst_31 [2] : vector<1x8x128xf32> to vector<1x8xf32>
    %40 = vector.shape_cast %39 : vector<1x8xf32> to vector<1x8x1xf32>
    %41 = arith.addf %38, %40 : vector<1x8x1xf32>
    %c0_32 = arith.constant 0 : index
    %c0_33 = arith.constant 0 : index
    %c0_34 = arith.constant 0 : index
    %42 = vector.load %arg14[%c0_32, %c0_33, %c0_34] : memref<1x8x1xf32, #tpu.memory_space<vmem>>, vector<1x8x1xf32>
    tpu.vector_store %arg14[%c0_32, %c0_33, %c0_34], %41 {strides = array<i32>} : memref<1x8x1xf32, #tpu.memory_space<vmem>>, vector<1x8x1xf32>,
    %cst_35 = arith.constant dense<0.000000e+00> : vector<1x8x128xf32>
    %43 = tpu.matmul %36, %22, %cst_35 {dimension_numbers = #tpu.dot_dimension_numbers<[2], [1], [1], [2], [0, 0, 0, 1, 1, 2], [0], [0]>} : vector<1x8x128xf32>, vector<1x128x128xf32>, vector<1x8x128xf32> -> vector<1x8x128xf32>
    %c0_36 = arith.constant 0 : index
    %c0_37 = arith.constant 0 : index
    %c0_38 = arith.constant 0 : index
    %44 = vector.load %arg15[%c0_36, %c0_37, %c0_38] : memref<1x8x128xf32, #tpu.memory_space<vmem>>, vector<1x8x128xf32>
    %45 = vector.broadcast %33 : vector<1x8x1xf32> to vector<1x8x128xf32>
    %46 = arith.mulf %45, %44 : vector<1x8x128xf32>
    %47 = arith.addf %46, %43 : vector<1x8x128xf32>
    %c0_39 = arith.constant 0 : index
    %c0_40 = arith.constant 0 : index
    %c0_41 = arith.constant 0 : index
    %48 = vector.load %arg15[%c0_39, %c0_40, %c0_41] : memref<1x8x128xf32, #tpu.memory_space<vmem>>, vector<1x8x128xf32>
    tpu.vector_store %arg15[%c0_39, %c0_40, %c0_41], %47 {strides = array<i32>} : memref<1x8x128xf32, #tpu.memory_space<vmem>>, vector<1x8x128xf32>,
    %c0_42 = arith.constant 0 : index
    %c0_43 = arith.constant 0 : index
    %c0_44 = arith.constant 0 : index
    %49 = vector.load %arg13[%c0_42, %c0_43, %c0_44] : memref<1x8x1xf32, #tpu.memory_space<vmem>>, vector<1x8x1xf32>
    tpu.vector_store %arg13[%c0_42, %c0_43, %c0_44], %31 {strides = array<i32>} : memref<1x8x1xf32, #tpu.memory_space<vmem>>, vector<1x8x1xf32>,
    %c0_i32_45 = arith.constant 0 : i32
    %50 = arith.cmpi eq, %arg1, %c0_i32_45 : i32
    %51 = arith.extui %50 : i1 to i32
    %c0_i32_46 = arith.constant 0 : i32
    %52 = arith.cmpi ne, %51, %c0_i32_46 : i32
    scf.if %52 {
      %c0_47 = arith.constant 0 : index
      %c0_48 = arith.constant 0 : index
      %c0_49 = arith.constant 0 : index
      %53 = vector.load %arg15[%c0_47, %c0_48, %c0_49] : memref<1x8x128xf32, #tpu.memory_space<vmem>>, vector<1x8x128xf32>
      %c0_50 = arith.constant 0 : index
      %c0_51 = arith.constant 0 : index
      %c0_52 = arith.constant 0 : index
      %54 = vector.load %arg14[%c0_50, %c0_51, %c0_52] : memref<1x8x1xf32, #tpu.memory_space<vmem>>, vector<1x8x1xf32>
      %55 = tpu.reciprocal %54 : vector<1x8x1xf32> -> vector<1x8x1xf32>
      %56 = vector.broadcast %55 : vector<1x8x1xf32> to vector<1x8x128xf32>
      %57 = arith.mulf %53, %56 : vector<1x8x128xf32>
      %c0_53 = arith.constant 0 : index
      %c0_54 = arith.constant 0 : index
      %c0_55 = arith.constant 0 : index
      %58 = vector.load %arg11[%c0_53, %c0_54, %c0_55] : memref<1x8x128xf32, #tpu.memory_space<vmem>>, vector<1x8x128xf32>
      tpu.vector_store %arg11[%c0_53, %c0_54, %c0_55], %57 {strides = array<i32>} : memref<1x8x128xf32, #tpu.memory_space<vmem>>, vector<1x8x128xf32>,
      %59 = vector.shape_cast %57 : vector<1x8x128xf32> to vector<8x128xf32>
      %c0_56 = arith.constant 0 : index
      %c0_57 = arith.constant 0 : index
      %60 = vector.load %arg8[%c0_56, %c0_57] : memref<128x128xf32, #tpu.memory_space<vmem>>, vector<128x128xf32>
      %cst_58 = arith.constant dense<0.000000e+00> : vector<8x128xf32>
      %61 = tpu.matmul %59, %60, %cst_58 {dimension_numbers = #tpu.dot_dimension_numbers<[1], [0], [0], [1], [0, 0, 1, 1], [], []>} : vector<8x128xf32>, vector<128x128xf32>, vector<8x128xf32> -> vector<8x128xf32>
      %c0_59 = arith.constant 0 : index
      %c0_60 = arith.constant 0 : index
      %62 = vector.load %arg9[%c0_59, %c0_60] : memref<1x128xf32, #tpu.memory_space<vmem>>, vector<1x128xf32>
      %63 = vector.broadcast %62 : vector<1x128xf32> to vector<8x128xf32>
      %64 = arith.addf %61, %63 : vector<8x128xf32>
      %65 = vector.shape_cast %64 : vector<8x128xf32> to vector<1x8x128xf32>
      %c0_61 = arith.constant 0 : index
      %c0_62 = arith.constant 0 : index
      %c0_63 = arith.constant 0 : index
      %66 = vector.load %arg10[%c0_61, %c0_62, %c0_63] : memref<1x8x128xf32, #tpu.memory_space<vmem>>, vector<1x8x128xf32>
      tpu.vector_store %arg10[%c0_61, %c0_62, %c0_63], %65 {strides = array<i32>} : memref<1x8x128xf32, #tpu.memory_space<vmem>>, vector<1x8x128xf32>,
    } else {
    }
    return
  }
  func.func @transform_0(%arg0: i32, %arg1: i32) -> (i32, i32, i32) {
    %c0_i32 = arith.constant 0 : i32
    %c0_i32_0 = arith.constant 0 : i32
    %c0_i32_1 = arith.constant 0 : i32
    return %arg0, %c0_i32, %c0_i32_0 : i32, i32, i32
  }
  func.func @transform_1(%arg0: i32, %arg1: i32) -> (i32, i32, i32) {
    %c0_i32 = arith.constant 0 : i32
    %c0_i32_0 = arith.constant 0 : i32
    return %arg0, %arg1, %c0_i32 : i32, i32, i32
  }
  func.func @transform_2(%arg0: i32, %arg1: i32) -> (i32, i32, i32) {
    %c0_i32 = arith.constant 0 : i32
    %c0_i32_0 = arith.constant 0 : i32
    return %arg0, %arg1, %c0_i32 : i32, i32, i32
  }
  func.func @transform_3(%arg0: i32, %arg1: i32) -> (i32, i32, i32) {
    %c0_i32 = arith.constant 0 : i32
    %c0_i32_0 = arith.constant 0 : i32
    return %arg0, %c0_i32, %arg1 : i32, i32, i32
  }
  func.func @transform_4(%arg0: i32, %arg1: i32) -> (i32, i32, i32) {
    %c0_i32 = arith.constant 0 : i32
    %c0_i32_0 = arith.constant 0 : i32
    %c0_i32_1 = arith.constant 0 : i32
    %c0_i32_2 = arith.constant 0 : i32
    return %c0_i32, %c0_i32_0, %c0_i32_1 : i32, i32, i32
  }
  func.func @transform_5(%arg0: i32, %arg1: i32) -> (i32, i32, i32) {
    %c0_i32 = arith.constant 0 : i32
    %c0_i32_0 = arith.constant 0 : i32
    %c0_i32_1 = arith.constant 0 : i32
    %c0_i32_2 = arith.constant 0 : i32
    return %c0_i32, %c0_i32_0, %c0_i32_1 : i32, i32, i32
  }
  func.func @transform_6(%arg0: i32, %arg1: i32) -> (i32, i32) {
    %c0_i32 = arith.constant 0 : i32
    %c0_i32_0 = arith.constant 0 : i32
    %c0_i32_1 = arith.constant 0 : i32
    return %c0_i32, %c0_i32_0 : i32, i32
  }
  func.func @transform_7(%arg0: i32, %arg1: i32) -> (i32, i32) {
    %c0_i32 = arith.constant 0 : i32
    %c0_i32_0 = arith.constant 0 : i32
    %c0_i32_1 = arith.constant 0 : i32
    return %c0_i32, %c0_i32_0 : i32, i32
  }
  func.func @transform_8(%arg0: i32, %arg1: i32) -> (i32, i32, i32) {
    %c0_i32 = arith.constant 0 : i32
    %c0_i32_0 = arith.constant 0 : i32
    %c0_i32_1 = arith.constant 0 : i32
    return %arg0, %c0_i32, %c0_i32_0 : i32, i32, i32
  }
  func.func @transform_9(%arg0: i32, %arg1: i32) -> (i32, i32, i32) {
    %c0_i32 = arith.constant 0 : i32
    %c0_i32_0 = arith.constant 0 : i32
    %c0_i32_1 = arith.constant 0 : i32
    return %arg0, %c0_i32, %c0_i32_0 : i32, i32, i32
  }
}

</mosaic_0001>

<bundles_post_ra>
// kernel: tpu_custom_call.1
= control target key start
LH: loop header
LB: loop body
LE: loop exit
PB: predicated region body
PF: predicated region fallthrough
CT: control target
= control target key end

     0   :  { %s1994_s0 = inlined_call_operand.hbm [shape: f32[2,8,128], index: 0, kind: input, shape index: {}]   ;;  %s1995_s1 = inlined_call_operand.hbm [shape: f32[2,128,128], index: 1, kind: input, shape index: {}]   ;;  %s1996_s2 = inlined_call_operand.hbm [shape: f32[2,128,128], index: 2, kind: input, shape index: {}]   ;;  %s1997_s3 = inlined_call_operand.hbm [shape: f32[2,1,128], index: 3, kind: input, shape index: {}]   ;;  %s1998_s4 = inlined_call_operand.hbm [shape: f32[3,128,128], index: 4, kind: input, shape index: {}]   ;;  %s1999_s5 = inlined_call_operand.vmem [shape: f32[3,1,128], index: 5, kind: input, shape index: {}]   ;;  %s2000_s6 = inlined_call_operand.hbm [shape: f32[128,128], index: 6, kind: input, shape index: {}]   ;;  %s2001_s7 = inlined_call_operand.vmem [shape: f32[1,128], index: 7, kind: input, shape index: {}]   ;;  %s2002_s8 = inlined_call_operand.hbm [shape: f32[2,8,128], index: 8, kind: output, shape index: {0}]   ;;  %s2003_s9 = inlined_call_operand.hbm [shape: f32[2,8,128], index: 9, kind: output, shape index: {1}]  }
   0x1   :  { %2017 = sst [smem:[#allocation34_spill]] %s1995_s1 }
   0x2   :  { %2018 = sst [smem:[#allocation35_spill]] %s1998_s4 }
   0x3   :  { %2019 = sst [smem:[#allocation36_spill]] %s2001_s7 }
   0x4   :  { %2020 = sst [smem:[#allocation37_spill]] %s2002_s8 }
   0x5   :  { %2021 = sst [smem:[#allocation38_spill]] %s2003_s9 }
   0x6   :  { %15 = vsyncpa [#allocation7], 0 }
   0x7   :  { %17 = vsyncpa [#allocation7 + $0x1], 0 }
   0x8   :  { %18 = vsyncpa [#allocation10], 0 }
   0x9   :  { %20 = vsyncpa [#allocation10 + $0x1], 0 }
   0xa   :  { %21 = vsyncpa [#allocation13], 0 }
   0xb   :  { %23 = vsyncpa [#allocation13 + $0x1], 0 }
   0xc   :  { %24 = vsyncpa [#allocation16], 0 }
   0xd   :  { %25 = vsyncpa [#allocation8], 0 }
   0xe   :  { %27 = vsyncpa [#allocation8 + $0x1], 0 }
   0xf   :  { %28 = vsyncpa [#allocation19], 0 }
  0x10   :  { %30 = vsyncpa [#allocation19 + $0x1], 0  ;;  %s1692_s30 = smov 0   ;;  %s1694_s10 = smov 0  }
  0x11   :  { %s1696_s11 = smov 0   ;;  %s1698_s12 = smov 0  }
  0x12   :  { %s1700_s13 = smov 0   ;;  %s1702_s14 = smov 0  }
  0x13 LB: > { %2022 = sst [smem:[#allocation27_spill]] %s1613_s30  ;;  %s1723_s15 = sadd.s32 4294967295, %s1633_s14   ;;  %s1633_s14 = sphi %s1702_s14, %s36_s14   ;;  %s1629_s13 = sphi %s1700_s13, %s2054_s13   ;;  %s1625_s12 = sphi %s1698_s12, %s2053_s12   ;;  %s1621_s11 = sphi %s1696_s11, %s2049_s11   ;;  %s1617_s10 = sphi %s1694_s10, %s2052_s10   ;;  %s1613_s30 = sphi %s1692_s30, %s2051_s30  }
  0x14   : > { %2023 = sst [smem:[#allocation28_spill]] %s1621_s11  ;;  %s1170_s16 = sadd.s32 4294967294, %s1633_s14  }
  0x15   : > { %2024 = sst [smem:[#allocation29_spill]] %s1625_s12  ;;  %p68_p0 = scmp.ne.s32.totalorder %s1617_s10, %s1613_s30 }
  0x16   : > { %p69_p1 = scmp.eq.s32.totalorder %s1723_s15, 0  ;;  %p260_p2 = scmp.eq.s32.totalorder %s1723_s15, 1 }
  0x17   : > { %p266_p3 = scmp.eq.s32.totalorder %s1170_s16, 1  ;;  %p1171_p5 = scmp.ge.s32.totalorder %s1633_s14, 1 }
  0x18   : > { %p1732_p4 = por %p69_p1, %p68_p0  ;;  %p299_p7 = scmp.lt.s32.totalorder %s1633_s14, 3 }
  0x19   : > { %p1737_p6 = por %p266_p3, %p68_p0  ;;  %s2028_s4 = sld [smem:[#allocation35_spill]] }
  0x1a   : > { %p1745_p8 = pnand %p1171_p5, %p299_p7  ;;  %s1635_s23 = smov [#allocation14]  }
  0x1b   : > { %s2026_s18 = scalar_select %p1737_p6, 1, 0 }
  0x1c   : > { %p1221_p9 = pneg %p1745_p8  ;;  %s312_s24 = sshll.u32 %s1635_s23, 4  ;;  %s313_s24 = int_to_ptr.vmem [resolvable:$true] %s312_s24 }
  0x1d   : > { %2027 = sst [smem:[#allocation30_spill]] %s2026_s18  ;;  %s2004_s26 = smov 128  }
  0x1e   : > { %p1753_p10 = pnand %p1221_p9, %p69_p1  ;;  %s2006_s27 = smov 8  }
  0x1f   : > { %s310_s21 = sshll.u32 %s2028_s4, 4  ;;  %s48_s28 = sadd.s32 1, %s1629_s13  ;;  %s311_s21 = int_to_ptr.hbm [resolvable:$true] %s310_s21 }
  0x20   : > { %1224 = dma.hbm_to_vmem [thread:$0]  (!%p1753_p10), %s311_s21, 6144, %s313_s24, [#allocation13], %s2004_s26, %s2004_s26, %s2006_s27  }
  0x21   : > { %p50_p12 = scmp.ge.s32.totalorder %s48_s28, 2  ;;  %s55_s29 = sadd.s32 1, %s1621_s11 }
  0x22   : > { %p62_p13 = scmp.ne.s32.totalorder %s1621_s11, %s1617_s10  ;;  %p63_p0 = scmp.eq.s32.totalorder %s1633_s14, 0 }
  0x23   : > { %s2056_s28 = smov (%p50_p12, %s48_s28), 0  ;;  %p1250_p7 = scmp.lt.s32.totalorder %s1633_s14, 2 }
  0x24   : > { %2031 = sst [smem:[#allocation31_spill]] %s2056_s28  ;;  %p64_p3 = por %p63_p0, %p62_p13 }
  0x25   : > { %p1772_p5 = por %p260_p2, %p62_p13  ;;  %s52_s19 = ssub.s32 %s1629_s13, %s2056_s28 }
  0x26   : > { %p53_p9 = scmp.eq.s32.totalorder %s52_s19, 0  ;;  %s1780_s20 = sand.u32 1, %s1621_s11  }
  0x27   : > { %s2032_s16 = scalar_select %p1772_p5, 1, 0 }
  0x28   : > { %p1782_p11 = pnand %p1250_p7, %p64_p3  ;;  %s2016_s23 = sand.u32 1, %s1633_s14  }
  0x29   : > { %2033 = sst [smem:[#allocation32_spill]] %s2032_s16  ;;  %s1177_s26 = sshll.u32 %s1780_s20, 7 }
  0x2a   : > { %s1788_s24 = scalar_select %p53_p9, %s1621_s11, %s55_s29  }
  0x2b   : > { %s1199_s27 = sshll.u32 %s1629_s13, 7  ;;  %s2036_s1 = sld [smem:[#allocation34_spill]] }
  0x2c   : > { %2035 = sst [smem:[#allocation33_spill]] %s1788_s24  ;;  %s369_s7 = scalar_lea.vmem [#allocation9], %s1177_s26 }
  0x2d   : > { %s379_s19 = sshll.u32 %s369_s7, 4  ;;  %s366_s8 = scalar_lea.sflag [#allocation10], %s2016_s23  ;;  %s380_s19 = int_to_ptr.vmem [resolvable:$true] %s379_s19 }
  0x2e   : > { %s2037_s9 = smov 8   ;;  %s2038_s29 = smov 128  }
  0x2f   : > { %s400_s4 = scalar_lea.hbm %s1996_s2, %s1199_s27  ;;  %s327_s23 = sshll.u32 %s2000_s6, 4  ;;  %s328_s23 = int_to_ptr.hbm [resolvable:$true] %s327_s23 }
  0x30   : > { %s401_s18 = sshll.u32 %s400_s4, 4  ;;  %s1638_s12 = smov [#allocation15]   ;;  %s402_s18 = int_to_ptr.hbm [resolvable:$true] %s401_s18 }
  0x31   : > { %s376_s30 = scalar_lea.hbm %s2036_s1, %s1199_s27  ;;  %s1175_s11 = sshll.u32 %s1780_s20, 3 }
  0x32   : > { %s377_s28 = sshll.u32 %s376_s30, 4  ;;  %s393_s30 = scalar_lea.vmem [#allocation11], %s1177_s26  ;;  %s378_s28 = int_to_ptr.hbm [resolvable:$true] %s377_s28 }
  0x33   : > { %1234 = dma.hbm_to_vmem [thread:$0]  (!%p1782_p11), %s378_s28, 2048, %s380_s19, %s366_s8, %s2038_s29, %s2038_s29, %s2037_s9  }
  0x34   : > { %s403_s1 = sshll.u32 %s393_s30, 4  ;;  %s329_s28 = sshll.u32 %s1638_s12, 4  ;;  %s404_s1 = int_to_ptr.vmem [resolvable:$true] %s403_s1  ;;  %s330_s28 = int_to_ptr.vmem [resolvable:$true] %s329_s28 }
  0x35   : > { %1227 = dma.hbm_to_vmem [thread:$0]  (!%p1753_p10), %s328_s23, 2048, %s330_s28, [#allocation16], %s2038_s29, %s2038_s29, %s2037_s9  }
  0x36   : > { %s1176_s26 = sshll.u32 %s1629_s13, 3  ;;  %s350_s4 = scalar_lea.vmem [#allocation6], %s1175_s11 }
  0x37   : > { %s354_s16 = scalar_lea.hbm %s1994_s0, %s1176_s26  ;;  %s358_s30 = sshll.u32 %s350_s4, 4  ;;  %s359_s30 = int_to_ptr.vmem [resolvable:$true] %s358_s30 }
  0x38   : > { %s356_s19 = sshll.u32 %s354_s16, 4  ;;  %s347_s12 = scalar_lea.sflag [#allocation7], %s1780_s20  ;;  %s357_s19 = int_to_ptr.hbm [resolvable:$true] %s356_s19 }
  0x39   : > { %1231 = dma.hbm_to_vmem [thread:$0]  (!%p1782_p11), %s357_s19, 128, %s359_s30, %s347_s12  }
  0x3a   : > { %1237 = dma.hbm_to_vmem [thread:$0]  (!%p1782_p11), %s402_s18, 2048, %s404_s1, %s366_s8, %s2038_s29, %s2038_s29, %s2037_s9  }
  0x3b   : > { %s420_s7 = scalar_lea.hbm %s1997_s3, %s1629_s13  ;;  %s416_s28 = scalar_lea.vmem [#allocation12], %s1780_s20 }
  0x3c   : > { %s424_s26 = sshll.u32 %s416_s28, 4  ;;  %s422_s27 = sshll.u32 %s420_s7, 4  ;;  %s425_s26 = int_to_ptr.vmem [resolvable:$true] %s424_s26  ;;  %s423_s27 = int_to_ptr.hbm [resolvable:$true] %s422_s27 }
  0x3d   : > { %s2039_s11 = sand.u32 1, %s1633_s14   ;;  %433 = sbr.rel (%p1745_p8) target bundleno = 1165 (0x48d), region = 52 }
  0x3e   : > { %s414_s24 = scalar_lea.sflag [#allocation13], %s2039_s11  ;;  %s1838_s16 = sand.u32 (!%p1745_p8), 1, %s1617_s10  }
  0x3f   : > { %1240 = dma.hbm_to_vmem [thread:$0]  (!%p1782_p11), %s423_s27, 16, %s425_s26, %s414_s24  }
  0x40   : > { %s1841_s1 = sshll.u32 (!%p1745_p8), %s1838_s16, 3  ;;  %s436_s8 = scalar_lea.sflag (!%p1745_p8), [#allocation7], %s1838_s16 }
  0x41   : > { %s439_s9 = scalar_lea.vmem (!%p1745_p8), [#allocation6], %s1841_s1 }
  0x42   : > { %1584 = dma.done.wait (%p1732_p4), %s436_s8, 128  }
  0x43   : > { %1586 = vsyncadd (%p1732_p4), %s436_s8, 4294967168  ;;  %s445_s22 = sand.u32 1, %s1723_s15   ;;  %s1185_s20 = sshll.u32 %s1838_s16, 7 }
  0x44   : > { %s446_s21 = scalar_lea.sflag [#allocation10], %s445_s22  ;;  %s1851_s29 = scalar_lea.vmem [#allocation9], %s1185_s20 }
  0x45   : > { %1588 = dma.done.wait (%p1732_p4), %s446_s21, 4096  }
  0x46   : > { %1590 = vsyncadd (%p1732_p4), %s446_s21, 4294963200  ;;  %s1857_s18 = scalar_lea.vmem [#allocation11], %s1185_s20  ;;  %s466_s19 = scalar_lea.sflag [#allocation13], %s445_s22 }
  0x47   : > { %s468_s4 = scalar_lea.vmem [#allocation12], %s1838_s16 }
  0x48   : > { %1592 = dma.done.wait (%p1732_p4), %s466_s19, 16  }
  0x49   : > { %1594 = vsyncadd (%p1732_p4), %s466_s19, 4294967280 }
  0x4a   : > { %1596 = dma.done.wait (%p69_p1), [#allocation13], 6144  }
  0x4b   : > { %1598 = vsyncadd (%p69_p1), [#allocation13], 4294961152 }
  0x4c   : > { %1600 = dma.done.wait (%p69_p1), [#allocation16], 2048  }
  0x4d   : > { %1602 = vsyncadd (%p69_p1), [#allocation16], 4294965248  ;;  %v617_v0 = vld [vmem:[#allocation14 + $0xf8] sm:$0xff]  ;;  %v616_v1 = vld [vmem:[#allocation14 + $0xf0] sm:$0xff]  ;;  %vm581_vm0 = vcmask 7168   ;;  %s2040_s7 = sld [smem:[#allocation29_spill]] }
  0x4e   : > { %623 = vmatpush.msra.mxu1 %v617_v0  ;;  %v615_v2 = vld [vmem:[#allocation14 + $0xe8] sm:$0xff]  ;;  %v614_v3 = vld [vmem:[#allocation14 + $0xe0] sm:$0xff]  ;;  %v613_v4 = vld [vmem:[#allocation14 + $0xd8] sm:$0xff]  ;;  %s2042_s24 = sld [smem:[#allocation38_spill]]  ;;  %s941_s21 = scalar_lea.sflag [#allocation19], %s1838_s16 }
  0x4f   : > { %v612_v5 = vld [vmem:[#allocation14 + $0xd0] sm:$0xff]  ;;  %v611_v6 = vld [vmem:[#allocation14 + $0xc8] sm:$0xff]  ;;  %v610_v7 = vld [vmem:[#allocation14 + $0xc0] sm:$0xff] }
  0x50   : > { %624 = vmatpush.msra.mxu1 %v616_v1  ;;  %v609_v8 = vld [vmem:[#allocation14 + $0xb8] sm:$0xff]  ;;  %v608_v9 = vld [vmem:[#allocation14 + $0xb0] sm:$0xff]  ;;  %v607_v10 = vld [vmem:[#allocation14 + $0xa8] sm:$0xff] }
  0x51   : > { %v606_v11 = vld [vmem:[#allocation14 + $0xa0] sm:$0xff]  ;;  %v605_v12 = vld [vmem:[#allocation14 + $0x98] sm:$0xff]  ;;  %v604_v13 = vld [vmem:[#allocation14 + $0x90] sm:$0xff] }
  0x52   : > { %625 = vmatpush.msra.mxu1 %v615_v2  ;;  %v603_v14 = vld [vmem:[#allocation14 + $0x88] sm:$0xff]  ;;  %v602_v15 = vld [vmem:[#allocation14 + $0x80] sm:$0xff]  ;;  %v588_v19 = vld [vmem:[%s1851_s29 + $0x18] sm:$0xff] }
  0x53   : > { %v585_v16 = vld [vmem:[%s1851_s29] sm:$0xff]  ;;  %v586_v17 = vld [vmem:[%s1851_s29 + $0x8] sm:$0xff]  ;;  %v587_v18 = vld [vmem:[%s1851_s29 + $0x10] sm:$0xff]  ;;  %s1195_s26 = sshll.u32 %s2040_s7, 3 }
  0x54   : > { %626 = vmatpush.msra.mxu1 %v614_v3  ;;  %v589_v20 = vld [vmem:[%s1851_s29 + $0x20] sm:$0xff]  ;;  %v590_v21 = vld [vmem:[%s1851_s29 + $0x28] sm:$0xff]  ;;  %v591_v22 = vld [vmem:[%s1851_s29 + $0x30] sm:$0xff]  ;;  %s965_s8 = scalar_lea.hbm %s2042_s24, %s1195_s26  ;;  %s1523_s15 = scalar_lea.hbm %s2042_s24, 16 }
  0x55   : > { %v592_v23 = vld [vmem:[%s1851_s29 + $0x38] sm:$0xff]  ;;  %v593_v24 = vld [vmem:[%s1851_s29 + $0x40] sm:$0xff]  ;;  %v594_v25 = vld [vmem:[%s1851_s29 + $0x48] sm:$0xff]  ;;  %s969_s20 = sshll.u32 %s965_s8, 4  ;;  %s970_s20 = int_to_ptr.hbm [resolvable:$true] %s969_s20 }
  0x56   : > { %627 = vmatpush.msra.mxu1 %v613_v4  ;;  %v595_v26 = vld [vmem:[%s1851_s29 + $0x50] sm:$0xff]  ;;  %v596_v27 = vld [vmem:[%s1851_s29 + $0x58] sm:$0xff]  ;;  %v597_v28 = vld [vmem:[%s1851_s29 + $0x60] sm:$0xff] }
  0x57   : > { %v598_v29 = vld [vmem:[%s1851_s29 + $0x68] sm:$0xff]  ;;  %v599_v30 = vld [vmem:[%s1851_s29 + $0x70] sm:$0xff]  ;;  %v600_v31 = vld [vmem:[%s1851_s29 + $0x78] sm:$0xff]  ;;  %s1517_s29 = sshra.s32 %s970_s20, 4  ;;  %s1518_s29 = int_to_ptr.hbm [resolvable:$true] %s1517_s29 }
  0x58   : > { %628 = vmatpush.msra.mxu1 %v612_v5  ;;  %v555_v32 = vld [vmem:[#allocation14 + $0x78] sm:$0xff]  ;;  %v554_v33 = vld [vmem:[#allocation14 + $0x70] sm:$0xff]  ;;  %v553_v34 = vld [vmem:[#allocation14 + $0x68] sm:$0xff]  ;;  %p1524_p8 = scmp.lt.s32.totalorder %s1518_s29, %s2042_s24 }
  0x59   : > { %560 = vmatpush.msra.mxu0 %v555_v32  ;;  %v552_v36 = vld [vmem:[#allocation14 + $0x60] sm:$0xff]  ;;  %v551_v37 = vld [vmem:[#allocation14 + $0x58] sm:$0xff]  ;;  %v550_v38 = vld [vmem:[#allocation14 + $0x50] sm:$0xff] }
  0x5a   : > { %629 = vmatpush.msra.mxu1 %v611_v6  ;;  %v549_v39 = vld [vmem:[#allocation14 + $0x48] sm:$0xff]  ;;  %v548_v41 = vld [vmem:[#allocation14 + $0x40] sm:$0xff]  ;;  %v547_v42 = vld [vmem:[#allocation14 + $0x38] sm:$0xff] }
  0x5b   : > { %561 = vmatpush.msra.mxu0 %v554_v33  ;;  %v546_v43 = vld [vmem:[#allocation14 + $0x30] sm:$0xff]  ;;  %v545_v44 = vld [vmem:[#allocation14 + $0x28] sm:$0xff]  ;;  %v544_v46 = vld [vmem:[#allocation14 + $0x20] sm:$0xff] }
  0x5c   : > { %630 = vmatpush.msra.mxu1 %v610_v7  ;;  %v543_v47 = vld [vmem:[#allocation14 + $0x18] sm:$0xff]  ;;  %v542_v48 = vld [vmem:[#allocation14 + $0x10] sm:$0xff]  ;;  %v541_v49 = vld [vmem:[#allocation14 + $0x8] sm:$0xff] }
  0x5d   : > { %562 = vmatpush.msra.mxu0 %v553_v34  ;;  %v540_v51 = vld [vmem:[#allocation14] sm:$0xff]  ;;  %v539_v52 = vld [vmem:[%s439_s9] sm:$0xff]  ;;  %v1312_v0 = vld [vmem:[%s1999_s5 + $0x1] ss:$0 sm:$0xff]  ;;  %s532_s9 = scalar_lea.vmem [#allocation18], %s1841_s1 }
  0x5e   : > { %631 = vmatpush.msra.mxu1 %v609_v8  ;;  %v706_v33 = vld [vmem:[#allocation14 + $0x108] sm:$0xff]  ;;  %s967_s22 = sshll.u32 %s532_s9, 4  ;;  %s968_s22 = int_to_ptr.vmem [resolvable:$true] %s967_s22 }
  0x5f   : > { %563 = vmatpush.msra.mxu0 %v552_v36 }
  0x60   : > { %632 = vmatpush.msra.mxu1 %v608_v9 }
  0x61   : > { %564 = vmatpush.msra.mxu0 %v551_v37  ;;  %v705_v37 = vld [vmem:[#allocation14 + $0x100] sm:$0xff] }
  0x62   : > { %633 = vmatpush.msra.mxu1 %v607_v10 }
  0x63   : > { %565 = vmatpush.msra.mxu0 %v550_v38  ;;  %v688_v38 = vld [vmem:[%s1857_s18] sm:$0xff] }
  0x64   : > { %634 = vmatpush.msra.mxu1 %v606_v11  ;;  %v720_v11 = vld [vmem:[#allocation14 + $0x178] sm:$0xff] }
  0x65   : > { %566 = vmatpush.msra.mxu0 %v549_v39  ;;  %726 = vmatpush.msra.mxu2 %v720_v11  ;;  %v689_v39 = vld [vmem:[%s1857_s18 + $0x8] sm:$0xff] }
  0x66   : > { %635 = vmatpush.msra.mxu1 %v605_v12  ;;  %v719_v12 = vld [vmem:[#allocation14 + $0x170] sm:$0xff] }
  0x67   : > { %567 = vmatpush.msra.mxu0 %v548_v41  ;;  %727 = vmatpush.msra.mxu2 %v719_v12  ;;  %v692_v41 = vld [vmem:[%s1857_s18 + $0x20] sm:$0xff] }
  0x68   : > { %636 = vmatpush.msra.mxu1 %v604_v13  ;;  %v718_v13 = vld [vmem:[#allocation14 + $0x168] sm:$0xff] }
  0x69   : > { %568 = vmatpush.msra.mxu0 %v547_v42  ;;  %728 = vmatpush.msra.mxu2 %v718_v13  ;;  %v693_v42 = vld [vmem:[%s1857_s18 + $0x28] sm:$0xff] }
  0x6a   : > { %637 = vmatpush.msra.mxu1 %v603_v14 }
  0x6b   : > { %569 = vmatpush.msra.mxu0 %v546_v43  ;;  %v694_v43 = vld [vmem:[%s1857_s18 + $0x30] sm:$0xff] }
  0x6c   : > { %638 = vmatpush.msra.mxu1 %v602_v15  ;;  %v717_v15 = vld [vmem:[#allocation14 + $0x160] sm:$0xff] }
  0x6d   : > { %639 = vmatmul.f32.vlgmr.msra.gmra.mxu1 %v585_v16  ;;  %570 = vmatpush.msra.mxu0 %v545_v44  ;;  %v716_v16 = vld [vmem:[#allocation14 + $0x158] sm:$0xff] }
  0x6e   : > { %729 = vmatpush.msra.mxu2 %v717_v15  ;;  %v695_v44 = vld [vmem:[%s1857_s18 + $0x38] sm:$0xff] }
  0x6f   : > { %571 = vmatpush.msra.mxu0 %v544_v46  ;;  %v697_v46 = vld [vmem:[%s1857_s18 + $0x48] sm:$0xff] }
  0x70   : > { %730 = vmatpush.msra.mxu2 %v716_v16 }
  0x71   : > { %572 = vmatpush.msra.mxu0 %v543_v47  ;;  %v698_v47 = vld [vmem:[%s1857_s18 + $0x50] sm:$0xff] }
  0x73   : > { %573 = vmatpush.msra.mxu0 %v542_v48  ;;  %v699_v48 = vld [vmem:[%s1857_s18 + $0x58] sm:$0xff] }
  0x75   : > { %642 = vmatmul.f32.gmra.mxu1 %v586_v17  ;;  %574 = vmatpush.msra.mxu0 %v541_v49  ;;  %v700_v49 = vld [vmem:[%s1857_s18 + $0x60] sm:$0xff] }
  0x77   : > { %575 = vmatpush.msra.mxu0 %v540_v51  ;;  %v702_v51 = vld [vmem:[%s1857_s18 + $0x70] sm:$0xff] }
  0x78   : > { %576 = vmatmul.f32.vlgmr.msra.gmra.mxu0 %v539_v52  ;;  %v1314_v52 = vld [vmem:[%s468_s4] ss:$0 sm:$0xff] }
  0x7d   : > { %645 = vmatmul.f32.gmra.mxu1 %v587_v18  ;;  %v715_v18 = vld [vmem:[#allocation14 + $0x150] sm:$0xff] }
  0x7e   : > { %731 = vmatpush.msra.mxu2 %v715_v18 }
  0x85   : > { %648 = vmatmul.f32.gmra.mxu1 %v588_v19  ;;  %v714_v19 = vld [vmem:[#allocation14 + $0x148] sm:$0xff] }
  0x86   : > { %732 = vmatpush.msra.mxu2 %v714_v19 }
  0x8d   : > { %651 = vmatmul.f32.gmra.mxu1 %v589_v20 }
  0x95   : > { %654 = vmatmul.f32.gmra.mxu1 %v590_v21  ;;  %v713_v21 = vld [vmem:[#allocation14 + $0x140] sm:$0xff] }
  0x96   : > { %733 = vmatpush.msra.mxu2 %v713_v21 }
  0x9d   : > { %657 = vmatmul.f32.gmra.mxu1 %v591_v22  ;;  %v712_v22 = vld [vmem:[#allocation14 + $0x138] sm:$0xff] }
  0x9e   : > { %734 = vmatpush.msra.mxu2 %v712_v22 }
  0xa5   : > { %660 = vmatmul.f32.gmra.mxu1 %v592_v23 }
  0xad   : > { %663 = vmatmul.f32.gmra.mxu1 %v593_v24  ;;  %v711_v24 = vld [vmem:[#allocation14 + $0x130] sm:$0xff] }
  0xae   : > { %735 = vmatpush.msra.mxu2 %v711_v24 }
  0xb5   : > { %666 = vmatmul.f32.gmra.mxu1 %v594_v25  ;;  %v710_v25 = vld [vmem:[#allocation14 + $0x128] sm:$0xff] }
  0xb6   : > { %736 = vmatpush.msra.mxu2 %v710_v25 }
  0xbd   : > { %669 = vmatmul.f32.gmra.mxu1 %v595_v26 }
  0xc5   : > { %672 = vmatmul.f32.gmra.mxu1 %v596_v27  ;;  %v709_v27 = vld [vmem:[#allocation14 + $0x120] sm:$0xff] }
  0xc6   : > { %737 = vmatpush.msra.mxu2 %v709_v27 }
  0xcd   : > { %675 = vmatmul.f32.gmra.mxu1 %v597_v28  ;;  %v708_v28 = vld [vmem:[#allocation14 + $0x118] sm:$0xff] }
  0xce   : > { %738 = vmatpush.msra.mxu2 %v708_v28 }
  0xd5   : > { %678 = vmatmul.f32.gmra.mxu1 %v598_v29 }
  0xdd   : > { %681 = vmatmul.f32.gmra.mxu1 %v599_v30  ;;  %v1313_v30 = vld [vmem:[%s1999_s5] ss:$0 sm:$0xff] }
  0xe5   : > { %684 = vmatmul.f32.gmra.mxu1 %v600_v31  ;;  %v707_v31 = vld [vmem:[#allocation14 + $0x110] sm:$0xff] }
  0xe6   : > { %739 = vmatpush.msra.mxu2 %v707_v31 }
  0xe8   : > { %740 = vmatpush.msra.mxu2 %v706_v33 }
  0xea   : > { %v1888_v35 = vpop.f32.mrf.mxu1  ;;  %741 = vmatpush.msra.mxu2 %v705_v37 }
  0xeb   : > { %v641_v34 = vadd.f32 %v1312_v0, %v1888_v35  ;;  %742 = vmatmul.f32.vlgmr.msra.gmra.mxu2 %v688_v38  ;;  %v691_v35 = vld [vmem:[%s1857_s18 + $0x18] sm:$0xff] }
  0xf2   : > { %v1890_v40 = vpop.f32.mrf.mxu1 }
  0xf3   : > { %v644_v29 = vadd.f32 %v1312_v0, %v1890_v40  ;;  %745 = vmatmul.f32.gmra.mxu2 %v689_v39  ;;  %v690_v40 = vld [vmem:[%s1857_s18 + $0x10] sm:$0xff] }
  0xf5   : > { %v577_v32 = vpop.f32.mrf.mxu0 }
  0xf6   : > { %v578_v36 = vadd.f32 %v1313_v30, %v577_v32 }
  0xfa   : > { %v1892_v45 = vpop.f32.mrf.mxu1 }
  0xfb   : > { %v647_v26 = vadd.f32 %v1312_v0, %v1892_v45  ;;  %748 = vmatmul.f32.gmra.mxu2 %v690_v40  ;;  %v696_v45 = vld [vmem:[%s1857_s18 + $0x40] sm:$0xff] }
  0xfc   : > { %v909_v40 = vld [vmem:[#allocation15 + $0x78] sm:$0xff] }
 0x102   : > { %v649_v50 = vpop.f32.mrf.mxu1 }
 0x103   : > { %v650_v23 = vadd.f32 %v1312_v0, %v649_v50  ;;  %751 = vmatmul.f32.gmra.mxu2 %v691_v35  ;;  %v701_v50 = vld [vmem:[%s1857_s18 + $0x68] sm:$0xff]  ;;  %v908_v35 = vld [vmem:[#allocation15 + $0x70] sm:$0xff] }
 0x10a   : > { %v652_v53 = vpop.f32.mrf.mxu1 }
 0x10b   : > { %v653_v20 = vadd.f32 %v1312_v0, %v652_v53  ;;  %754 = vmatmul.f32.gmra.mxu2 %v692_v41  ;;  %v907_v41 = vld [vmem:[#allocation15 + $0x68] sm:$0xff] }
 0x112   : > { %v655_v54 = vpop.f32.mrf.mxu1 }
 0x113   : > { %v656_v17 = vadd.f32 %v1312_v0, %v655_v54  ;;  %757 = vmatmul.f32.gmra.mxu2 %v693_v42 }
 0x11a   : > { %v658_v55 = vpop.f32.mrf.mxu1 }
 0x11b   : > { %v659_v14 = vadd.f32 %v1312_v0, %v658_v55  ;;  %760 = vmatmul.f32.gmra.mxu2 %v694_v43 }
 0x122   : > { %v661_v56 = vpop.f32.mrf.mxu1 }
 0x123   : > { %v662_v10 = vadd.f32 %v1312_v0, %v661_v56  ;;  %763 = vmatmul.f32.gmra.mxu2 %v695_v44  ;;  %v703_v56 = vld [vmem:[%s1857_s18 + $0x78] sm:$0xff]  ;;  %v906_v44 = vld [vmem:[#allocation15 + $0x60] sm:$0xff]  ;;  %s1519_s18 = scalar_lea.hbm %s1518_s29, 8 }
 0x124   : > { %p1520_p1 = scmp.ne.s32.totalorder %s1518_s29, %s1519_s18  ;;  %p1525_p10 = scmp.lt.s32.totalorder %s1523_s15, %s1519_s18 }
 0x126   : > { %p1521_p2 = pnand %p1520_p1, %p1772_p5  ;;  %p1526_p11 = por %p1525_p10, %p1524_p8 }
 0x128   : > { %p1522_p4 = pneg %p1521_p2 }
 0x12a   : > { %v664_v57 = vpop.f32.mrf.mxu1  ;;  %p1527_p12 = pnand %p1526_p11, %p1522_p4 }
 0x12b   : > { %v665_v9 = vadd.f32 %v1312_v0, %v664_v57  ;;  %766 = vmatmul.f32.gmra.mxu2 %v696_v45 }
 0x132   : > { %v667_v58 = vpop.f32.mrf.mxu1 }
 0x133   : > { %v668_v8 = vadd.f32 %v1312_v0, %v667_v58  ;;  %769 = vmatmul.f32.gmra.mxu2 %v697_v46  ;;  %v905_v46 = vld [vmem:[#allocation15 + $0x58] sm:$0xff] }
 0x13a   : > { %v670_v59 = vpop.f32.mrf.mxu1 }
 0x13b   : > { %v671_v7 = vadd.f32 %v1312_v0, %v670_v59  ;;  %772 = vmatmul.f32.gmra.mxu2 %v698_v47  ;;  %v904_v47 = vld [vmem:[#allocation15 + $0x50] sm:$0xff] }
 0x142   : > { %v673_v60 = vpop.f32.mrf.mxu1 }
 0x143   : > { %v674_v6 = vadd.f32 %v1312_v0, %v673_v60  ;;  %775 = vmatmul.f32.gmra.mxu2 %v699_v48  ;;  %v1639_v60 = vmov -inf   ;;  %v903_v48 = vld [vmem:[#allocation15 + $0x48] sm:$0xff] }
 0x144   : > { %582 = vst.msk [vmem:[#allocation3] sm:$0xff] %vm581_vm0, %v1639_v60 }
 0x14a   : > { %v676_v61 = vpop.f32.mrf.mxu1 }
 0x14b   : > { %v677_v5 = vadd.f32 %v1312_v0, %v676_v61  ;;  %778 = vmatmul.f32.gmra.mxu2 %v700_v49  ;;  %v902_v49 = vld [vmem:[#allocation15 + $0x40] sm:$0xff] }
 0x152   : > { %v679_v62 = vpop.f32.mrf.mxu1 }
 0x153   : > { %v680_v4 = vadd.f32 %v1312_v0, %v679_v62  ;;  %781 = vmatmul.f32.gmra.mxu2 %v701_v50 }
 0x15a   : > { %v682_v63 = vpop.f32.mrf.mxu1 }
 0x15b   : > { %v683_v3 = vadd.f32 %v1312_v0, %v682_v63  ;;  %784 = vmatmul.f32.gmra.mxu2 %v702_v51  ;;  %v901_v51 = vld [vmem:[#allocation15 + $0x38] sm:$0xff] }
 0x162   : > { %v685_v1 = vpop.f32.mrf.mxu1 }
 0x163   : > { %v686_v2 = vadd.f32 %v1312_v0, %v685_v1  ;;  %787 = vmatmul.f32.gmra.mxu2 %v703_v56 }
 0x165   : > { %796 = vmatpush.xpose.msra.mxu3 %v686_v2  ;;  %v1640_v2 = vmov 0  }
 0x166   : > { %1309 = vset.pattern.permute.xlu0 %v1640_v2  ;;  %1310 = vset.pattern.permute.xlu1 %v1640_v2 }
 0x167   : > { %1311 = vset.pattern.permute.xlu2 %v1640_v2 }
 0x169   : > { %797 = vmatpush.xpose.msra.mxu3 %v683_v3 }
 0x16d   : > { %798 = vmatpush.xpose.msra.mxu3 %v680_v4  ;;  %v1641_v4 = vmov 0.0  }
 0x16e   : > { %v1922_v54 = vpop.f32.mrf.mxu2  ;;  %583 = vst.msk [vmem:[#allocation4] sm:$0xff] %vm581_vm0, %v1641_v4  ;;  %v894_v4 = vld [vmem:[#allocation15] sm:$0xff] }
 0x171   : > { %799 = vmatpush.xpose.msra.mxu3 %v677_v5 }
 0x175   : > { %800 = vmatpush.xpose.msra.mxu3 %v674_v6  ;;  %v831_v39 = vld [vmem:[#allocation4] sm:$0xff] }
 0x176   : > { %v746_v57 = vpop.f32.mrf.mxu2 }
 0x179   : > { %801 = vmatpush.xpose.msra.mxu3 %v671_v7 }
 0x17d   : > { %802 = vmatpush.xpose.msra.mxu3 %v668_v8  ;;  %v816_v8 = vld [vmem:[#allocation3] sm:$0xff] }
 0x17e   : > { %v749_v58 = vpop.f32.mrf.mxu2 }
 0x181   : > { %803 = vmatpush.xpose.msra.mxu3 %v665_v9 }
 0x185   : > { %804 = vmatpush.xpose.msra.mxu3 %v662_v10 }
 0x186   : > { %v752_v59 = vpop.f32.mrf.mxu2 }
 0x189   : > { %805 = vmatpush.xpose.msra.mxu3 %v659_v14  ;;  %v1315_v14 = vld [vmem:[%s1999_s5 + $0x2] ss:$0 sm:$0xff] }
 0x18a   : > { %v753_v28 = vadd.f32 %v1315_v14, %v752_v59  ;;  %v747_v30 = vadd.f32 %v1315_v14, %v746_v57  ;;  %v744_v31 = vadd.f32 %v1315_v14, %v1922_v54  ;;  %v898_v54 = vld [vmem:[#allocation15 + $0x20] sm:$0xff]  ;;  %v897_v57 = vld [vmem:[#allocation15 + $0x18] sm:$0xff]  ;;  %v896_v59 = vld [vmem:[#allocation15 + $0x10] sm:$0xff] }
 0x18d   : > { %806 = vmatpush.xpose.msra.mxu3 %v656_v17 }
 0x18e   : > { %v755_v61 = vpop.f32.mrf.mxu2 }
 0x18f   : > { %v756_v27 = vadd.f32 %v1315_v14, %v755_v61 }
 0x191   : > { %807 = vmatpush.xpose.msra.mxu3 %v653_v20 }
 0x195   : > { %808 = vmatpush.xpose.msra.mxu3 %v650_v23 }
 0x196   : > { %v758_v62 = vpop.f32.mrf.mxu2 }
 0x199   : > { %809 = vmatpush.xpose.msra.mxu3 %v647_v26  ;;  %v759_v26 = vadd.f32 %v1315_v14, %v758_v62 }
 0x19d   : > { %810 = vmatpush.xpose.msra.mxu3 %v644_v29  ;;  %v750_v29 = vadd.f32 %v1315_v14, %v749_v58 }
 0x19e   : > { %v761_v63 = vpop.f32.mrf.mxu2 }
 0x19f   : > { %v762_v25 = vadd.f32 %v1315_v14, %v761_v63  ;;  %v895_v63 = vld [vmem:[#allocation15 + $0x8] sm:$0xff] }
 0x1a1   : > { %811 = vmatpush.xpose.msra.mxu3 %v641_v34 }
 0x1a4   : > { %812 = vmatmul.f32.vlgmr.msra.gmra.mxu3 %v578_v36 }
 0x1a6   : > { %v764_v0 = vpop.f32.mrf.mxu2 }
 0x1a7   : > { %v765_v24 = vadd.f32 %v1315_v14, %v764_v0 }
 0x1ae   : > { %v767_v1 = vpop.f32.mrf.mxu2 }
 0x1af   : > { %v768_v23 = vadd.f32 %v1315_v14, %v767_v1 }
 0x1b6   : > { %v770_v3 = vpop.f32.mrf.mxu2 }
 0x1b7   : > { %v771_v22 = vadd.f32 %v1315_v14, %v770_v3 }
 0x1be   : > { %v773_v5 = vpop.f32.mrf.mxu2 }
 0x1bf   : > { %v774_v21 = vadd.f32 %v1315_v14, %v773_v5 }
 0x1c6   : > { %v776_v6 = vpop.f32.mrf.mxu2 }
 0x1c7   : > { %v777_v20 = vadd.f32 %v1315_v14, %v776_v6 }
 0x1ce   : > { %v779_v7 = vpop.f32.mrf.mxu2 }
 0x1cf   : > { %v780_v19 = vadd.f32 %v1315_v14, %v779_v7 }
 0x1d6   : > { %v782_v12 = vpop.f32.mrf.mxu2 }
 0x1d7   : > { %v783_v18 = vadd.f32 %v1315_v14, %v782_v12 }
 0x1de   : > { %v785_v13 = vpop.f32.mrf.mxu2 }
 0x1df   : > { %v786_v16 = vadd.f32 %v1315_v14, %v785_v13 }
 0x1e6   : > { %v788_v15 = vpop.f32.mrf.mxu2 }
 0x1e7   : > { %v789_v17 = vadd.f32 %v1315_v14, %v788_v15 }
 0x1e9   : > { %838 = vmatpush.msrb.mxu0 %v789_v17 }
 0x1eb   : > { %839 = vmatpush.msrb.mxu0 %v786_v16 }
 0x1ed   : > { %840 = vmatpush.msrb.mxu0 %v783_v18 }
 0x1ef   : > { %841 = vmatpush.msrb.mxu0 %v780_v19 }
 0x1f1   : > { %842 = vmatpush.msrb.mxu0 %v777_v20 }
 0x1f3   : > { %843 = vmatpush.msrb.mxu0 %v774_v21 }
 0x1f5   : > { %844 = vmatpush.msrb.mxu0 %v771_v22 }
 0x1f7   : > { %845 = vmatpush.msrb.mxu0 %v768_v23 }
 0x1f9   : > { %846 = vmatpush.msrb.mxu0 %v765_v24 }
 0x1fb   : > { %847 = vmatpush.msrb.mxu0 %v762_v25 }
 0x1fd   : > { %848 = vmatpush.msrb.mxu0 %v759_v26 }
 0x1ff   : > { %849 = vmatpush.msrb.mxu0 %v756_v27 }
 0x201   : > { %850 = vmatpush.msrb.mxu0 %v753_v28 }
 0x203   : > { %851 = vmatpush.msrb.mxu0 %v750_v29 }
 0x205   : > { %852 = vmatpush.msrb.mxu0 %v747_v30 }
 0x207   : > { %853 = vmatpush.msrb.mxu0 %v744_v31 }
 0x209   : > { %914 = vmatpush.msra.mxu0 %v909_v40 }
 0x20b   : > { %915 = vmatpush.msra.mxu0 %v908_v35 }
 0x20d   : > { %916 = vmatpush.msra.mxu0 %v907_v41 }
 0x20f   : > { %917 = vmatpush.msra.mxu0 %v906_v44 }
 0x211   : > { %918 = vmatpush.msra.mxu0 %v905_v46 }
 0x213   : > { %919 = vmatpush.msra.mxu0 %v904_v47 }
 0x215   : > { %920 = vmatpush.msra.mxu0 %v903_v48 }
 0x217   : > { %921 = vmatpush.msra.mxu0 %v902_v49 }
 0x219   : > { %922 = vmatpush.msra.mxu0 %v901_v51 }
 0x227   : > { %v813_v53 = vpop.f32.mrf.mxu3 }
 0x228   : > { %v1924_v55 = vadd.f32 %v1314_v52, %v813_v53  ;;  %v900_v52 = vld [vmem:[#allocation15 + $0x30] sm:$0xff]  ;;  %v899_v53 = vld [vmem:[#allocation15 + $0x28] sm:$0xff] }
 0x229   : > { %923 = vmatpush.msra.mxu0 %v900_v52 }
 0x22a   : > { %817 = vmax.xlane.f32.xlu0 %v1924_v55 }
 0x22b   : > { %924 = vmatpush.msra.mxu0 %v899_v53 }
 0x22d   : > { %925 = vmatpush.msra.mxu0 %v898_v54 }
 0x22f   : > { %926 = vmatpush.msra.mxu0 %v897_v57 }
 0x231   : > { %927 = vmatpush.msra.mxu0 %v896_v59 }
 0x233   : > { %928 = vmatpush.msra.mxu0 %v895_v63 }
 0x235   : > { %929 = vmatpush.msra.mxu0 %v894_v4 }
 0x29d   : > { %v818_v9 = vpop.xlane.xlu0 %817 }
 0x29e   : > { %v819_v10 = vmax.f32 %v816_v8, %v818_v9 }
 0x2a0   : > { %v820_v11 = vsub.f32 %v816_v8, %v819_v10  ;;  %867 = vst.msk [vmem:[#allocation3] sm:$0xff] %vm581_vm0, %v819_v10  ;;  %825 = vperm.xlu0 %1309, %v819_v10  }
 0x2a2   : > { %v821_v37 = vmul.f32 1.442695, %v820_v11 }
 0x312   : > { %v826_v32 = vpop.permute.xlu0 %825 }
 0x313   : > { %v828_v33 = vsub.f32 %v1924_v55, %v826_v32 }
 0x315   : > { %v829_v34 = vmul.f32 1.442695, %v828_v33 }
 0x317   : > { %1317 = vpow2.f32 %v829_v34 }
 0x318   : > { %1319 = vpow2.f32 %v821_v37 }
 0x31d   : > { %v1318_v36 = vpop.eup %1317 }
 0x31e   : > { %833 = vadd.xlane.f32.xlu1 %v1318_v36  ;;  %854 = vmatmul.f32.vlgmr.msrb.gmra.mxu0 %v1318_v36  ;;  %v1320_v38 = vpop.eup %1319 }
 0x31f   : > { %v832_v42 = vmul.f32 %v1320_v38, %v831_v39 }
 0x337   : > { %861 = vperm.xlu1 %1310, %v1320_v38  }
 0x391   : > { %v834_v43 = vpop.xlane.xlu1 %833 }
 0x392   : > { %v835_v45 = vadd.f32 %v834_v43, %v832_v42 }
 0x394   : > { %837 = vst.msk [vmem:[#allocation4] sm:$0xff] %vm581_vm0, %v835_v45 }
 0x39b   : > { %v872_v50 = vld [vmem:[#allocation4] sm:$0xff]  ;;  %v855_v7 = vpop.f32.mrf.mxu0 }
 0x39c   : > { %1321 = vrcp.f32 %v872_v50  ;;  %v884_v60 = vand.u32 2147483648, %v872_v50  ;;  %v882_v62 = vand.u32 2147483647, %v872_v50  ;;  %vm878_vm2 = vweird.f32 %v872_v50 }
 0x39e   : > { %v885_v1 = vor.u32 1.1754944e-38, %v884_v60  ;;  %vm883_vm4 = vcmp.eq.f32.partialorder %v882_v62, 8.507059e+37 }
 0x3a2   : > { %v1322_v55 = vpop.eup %1321 }
 0x3a3   : > { %v874_v56 = vmul.f32 %v1322_v55, %v872_v50  ;;  %vm879_vm1 = vweird.f32 %v1322_v55 }
 0x3a4   : > { %vm880_vm3 = vmor %vm878_vm2, %vm879_vm1 }
 0x3a5   : > { %v875_v58 = vsub.f32 1.0, %v874_v56 }
 0x3a7   : > { %v876_v61 = vmul.f32 %v1322_v55, %v875_v58 }
 0x3a9   : > { %v877_v0 = vadd.f32 %v1322_v55, %v876_v61  ;;  %v862_v5 = vpop.permute.xlu1 %861 }
 0x3aa   : > { %v864_v6 = vmul.f32 0.0, %v862_v5 }
 0x3ab   : > { %v881_v2 = vsel %vm880_vm3, %v1322_v55, %v877_v0 }
 0x3ac   : > { %v886_v3 = vsel %vm883_vm4, %v885_v1, %v881_v2  ;;  %v865_v8 = vadd.f32 %v864_v6, %v855_v7 }
 0x3ad   : > { %889 = vperm.xlu2 %1311, %v886_v3  }
 0x407   : > { %v890_v9 = vpop.permute.xlu2 %889 }
 0x408   : > { %v892_v10 = vmul.f32 %v890_v9, %v865_v8 }
 0x40a   : > { %893 = vst [vmem:[%s532_s9] sm:$0xff] %v892_v10  ;;  %930 = vmatmul.f32.vlgmr.msra.gmra.mxu0 %v892_v10 }
 0x40b   : > { %1530 = shalt.err (!%p1527_p12)
}
 0x40c   : > { %1218 = dma.vmem_to_hbm [thread:$0]  (%p1772_p5), %s968_s22, 128, %s970_s20, %s941_s21  }
 0x40d   : > { %s2043_s23 = sld [smem:[#allocation37_spill]]  ;;  %s525_s9 = scalar_lea.vmem [#allocation17], %s1841_s1 }
 0x40e   : > { %s2044_s8 = sld [smem:[#allocation36_spill]]  ;;  %s953_s29 = sshll.u32 %s525_s9, 4  ;;  %s954_s29 = int_to_ptr.vmem [resolvable:$true] %s953_s29 }
 0x40f   : > { %s936_s19 = scalar_lea.sflag [#allocation8], %s1838_s16 }
 0x413   : > { %s951_s7 = scalar_lea.hbm %s2043_s23, %s1195_s26  ;;  %s1551_s21 = scalar_lea.hbm %s2043_s23, 16 }
 0x414   : > { %v1316_v11 = vld [vmem:[%s2044_s8] ss:$0 sm:$0xff]  ;;  %s955_s18 = sshll.u32 %s951_s7, 4  ;;  %s956_s18 = int_to_ptr.hbm [resolvable:$true] %s955_s18 }
 0x415   : > { %s1545_s4 = sshra.s32 %s956_s18, 4  ;;  %s1546_s4 = int_to_ptr.hbm [resolvable:$true] %s1545_s4 }
 0x416   : > { %s1547_s22 = scalar_lea.hbm %s1546_s4, 8  ;;  %p1552_p7 = scmp.lt.s32.totalorder %s1546_s4, %s2043_s23 }
 0x417   : > { %p1548_p13 = scmp.ne.s32.totalorder %s1546_s4, %s1547_s22  ;;  %p1553_p9 = scmp.lt.s32.totalorder %s1551_s21, %s1547_s22 }
 0x419   : > { %p1549_p0 = pnand %p1548_p13, %p1772_p5  ;;  %p1554_p1 = por %p1553_p9, %p1552_p7 }
 0x41b   : > { %p1550_p3 = pneg %p1549_p0 }
 0x41d   : > { %p1555_p2 = pnand %p1554_p1, %p1550_p3 }
 0x487   : > { %v931_v12 = vpop.f32.mrf.mxu0 }
 0x488   : > { %v932_v13 = vadd.f32 %v1316_v11, %v931_v12 }
 0x48a   : > { %934 = vst [vmem:[%s525_s9] sm:$0xff] %v932_v13 }
 0x48b   : > { %1558 = shalt.err (!%p1555_p2)
}
 0x48c   : > { %1217 = dma.vmem_to_hbm [thread:$0]  (%p1772_p5), %s954_s29, 128, %s956_s18, %s936_s19  }
 0x48d PF: > { %s2045_s16 = sld [smem:[#allocation27_spill]]  ;;  %p2047_p4 = scmp.ge.s32.totalorder %s1633_s14, 2 }
 0x48f   : > { %p1242_p8 = pnand %p2047_p4, %p1737_p6 }
 0x491   : > { %p1243_p10 = pneg %p1242_p8 }
 0x493   : > { %s981_s30 = sand.u32 1, %s2045_s16  }
 0x494   : > { %s982_s12 = scalar_lea.sflag [#allocation8], %s981_s30 }
 0x495   : > { %1604 = dma.done.wait (%p1243_p10), %s982_s12, 128  }
 0x496   : > { %1606 = vsyncadd (%p1243_p10), %s982_s12, 4294967168  ;;  %s992_s25 = scalar_lea.sflag [#allocation19], %s981_s30 }
 0x497   : > { %1608 = dma.done.wait (%p1243_p10), %s992_s25, 128  }
 0x498   : > { %1610 = vsyncadd (%p1243_p10), %s992_s25, 4294967168  ;;  %s36_s14 = sadd.s32 1, %s1633_s14   ;;  %s2048_s28 = sld [smem:[#allocation28_spill]] }
 0x499   : > { %p33_p11 = scmp.ge.s32.totalorder %s36_s14, 4   ;;  %s2049_s11 = sld [smem:[#allocation33_spill]] }
 0x49a   : > { %s2050_s7 = sld [smem:[#allocation31_spill]]  ;;  %s2051_s30 = smov %s1617_s10 }
 0x49b   : > { %s2053_s12 = smov %s1629_s13 }
 0x49c   :  { %35 = sbr.rel (!%p33_p11) target bundleno = 19 (0x13), region = 171 }
 0x49e   : > { %s2052_s10 = smov %s2048_s28 }
 0x4a0   : > { %s2054_s13 = smov %s2050_s7 }
 0x4a1   :  { %998 = vsyncpa [#allocation7], 1 }
 0x4a2   :  { %1000 = vsyncpa [#allocation7 + $0x1], 1 }
 0x4a3   :  { %1001 = vsyncpa [#allocation10], 1 }
 0x4a4   :  { %1003 = vsyncpa [#allocation10 + $0x1], 1 }
 0x4a5   :  { %1004 = vsyncpa [#allocation13], 1 }
 0x4a6   :  { %1006 = vsyncpa [#allocation13 + $0x1], 1 }
 0x4a7   :  { %1007 = vsyncpa [#allocation16], 1 }
 0x4a8   :  { %1008 = vsyncpa [#allocation8], 1 }
 0x4a9   :  { %1010 = vsyncpa [#allocation8 + $0x1], 1 }
 0x4aa   :  { %1011 = vsyncpa [#allocation19], 1 }
 0x4ab   :  { %1013 = vsyncpa [#allocation19 + $0x1], 1 }

// kernel: tpu_custom_call.1
= control target key start
LH: loop header
LB: loop body
LE: loop exit
PB: predicated region body
PF: predicated region fallthrough
CT: control target
= control target key end

     0   :  { %s1994_s0 = inlined_call_operand.hbm [shape: f32[2,8,128], index: 0, kind: input, shape index: {}]   ;;  %s1995_s1 = inlined_call_operand.hbm [shape: f32[2,128,128], index: 1, kind: input, shape index: {}]   ;;  %s1996_s2 = inlined_call_operand.hbm [shape: f32[2,128,128], index: 2, kind: input, shape index: {}]   ;;  %s1997_s3 = inlined_call_operand.hbm [shape: f32[2,1,128], index: 3, kind: input, shape index: {}]   ;;  %s1998_s4 = inlined_call_operand.hbm [shape: f32[3,128,128], index: 4, kind: input, shape index: {}]   ;;  %s1999_s5 = inlined_call_operand.vmem [shape: f32[3,1,128], index: 5, kind: input, shape index: {}]   ;;  %s2000_s6 = inlined_call_operand.hbm [shape: f32[128,128], index: 6, kind: input, shape index: {}]   ;;  %s2001_s7 = inlined_call_operand.vmem [shape: f32[1,128], index: 7, kind: input, shape index: {}]   ;;  %s2002_s8 = inlined_call_operand.hbm [shape: f32[2,8,128], index: 8, kind: output, shape index: {0}]   ;;  %s2003_s9 = inlined_call_operand.hbm [shape: f32[2,8,128], index: 9, kind: output, shape index: {1}]  }
   0x1   :  { %2017 = sst [smem:[#allocation34_spill]] %s1995_s1 }
   0x2   :  { %2018 = sst [smem:[#allocation35_spill]] %s1998_s4 }
   0x3   :  { %2019 = sst [smem:[#allocation36_spill]] %s2001_s7 }
   0x4   :  { %2020 = sst [smem:[#allocation37_spill]] %s2002_s8 }
   0x5   :  { %2021 = sst [smem:[#allocation38_spill]] %s2003_s9 }
   0x6   :  { %15 = vsyncpa [#allocation7], 0 }
   0x7   :  { %17 = vsyncpa [#allocation7 + $0x1], 0 }
   0x8   :  { %18 = vsyncpa [#allocation10], 0 }
   0x9   :  { %20 = vsyncpa [#allocation10 + $0x1], 0 }
   0xa   :  { %21 = vsyncpa [#allocation13], 0 }
   0xb   :  { %23 = vsyncpa [#allocation13 + $0x1], 0 }
   0xc   :  { %24 = vsyncpa [#allocation16], 0 }
   0xd   :  { %25 = vsyncpa [#allocation8], 0 }
   0xe   :  { %27 = vsyncpa [#allocation8 + $0x1], 0 }
   0xf   :  { %28 = vsyncpa [#allocation19], 0 }
  0x10   :  { %30 = vsyncpa [#allocation19 + $0x1], 0  ;;  %s1692_s30 = smov 0   ;;  %s1694_s10 = smov 0  }
  0x11   :  { %s1696_s11 = smov 0   ;;  %s1698_s12 = smov 0  }
  0x12   :  { %s1700_s13 = smov 0   ;;  %s1702_s14 = smov 0  }
  0x13 LB: > { %2022 = sst [smem:[#allocation27_spill]] %s1613_s30  ;;  %s1723_s15 = sadd.s32 4294967295, %s1633_s14   ;;  %s1633_s14 = sphi %s1702_s14, %s36_s14   ;;  %s1629_s13 = sphi %s1700_s13, %s2054_s13   ;;  %s1625_s12 = sphi %s1698_s12, %s2053_s12   ;;  %s1621_s11 = sphi %s1696_s11, %s2049_s11   ;;  %s1617_s10 = sphi %s1694_s10, %s2052_s10   ;;  %s1613_s30 = sphi %s1692_s30, %s2051_s30  }
  0x14   : > { %2023 = sst [smem:[#allocation28_spill]] %s1621_s11  ;;  %s1170_s16 = sadd.s32 4294967294, %s1633_s14  }
  0x15   : > { %2024 = sst [smem:[#allocation29_spill]] %s1625_s12  ;;  %p68_p0 = scmp.ne.s32.totalorder %s1617_s10, %s1613_s30 }
  0x16   : > { %p69_p1 = scmp.eq.s32.totalorder %s1723_s15, 0  ;;  %p260_p2 = scmp.eq.s32.totalorder %s1723_s15, 1 }
  0x17   : > { %p266_p3 = scmp.eq.s32.totalorder %s1170_s16, 1  ;;  %p1171_p5 = scmp.ge.s32.totalorder %s1633_s14, 1 }
  0x18   : > { %p1732_p4 = por %p69_p1, %p68_p0  ;;  %p299_p7 = scmp.lt.s32.totalorder %s1633_s14, 3 }
  0x19   : > { %p1737_p6 = por %p266_p3, %p68_p0  ;;  %s2028_s4 = sld [smem:[#allocation35_spill]] }
  0x1a   : > { %p1745_p8 = pnand %p1171_p5, %p299_p7  ;;  %s1635_s23 = smov [#allocation14]  }
  0x1b   : > { %s2026_s18 = scalar_select %p1737_p6, 1, 0 }
  0x1c   : > { %p1221_p9 = pneg %p1745_p8  ;;  %s312_s24 = sshll.u32 %s1635_s23, 4  ;;  %s313_s24 = int_to_ptr.vmem [resolvable:$true] %s312_s24 }
  0x1d   : > { %2027 = sst [smem:[#allocation30_spill]] %s2026_s18  ;;  %s2004_s26 = smov 128  }
  0x1e   : > { %p1753_p10 = pnand %p1221_p9, %p69_p1  ;;  %s2006_s27 = smov 8  }
  0x1f   : > { %s310_s21 = sshll.u32 %s2028_s4, 4  ;;  %s48_s28 = sadd.s32 1, %s1629_s13  ;;  %s311_s21 = int_to_ptr.hbm [resolvable:$true] %s310_s21 }
  0x20   : > { %1224 = dma.hbm_to_vmem [thread:$0]  (!%p1753_p10), %s311_s21, 6144, %s313_s24, [#allocation13], %s2004_s26, %s2004_s26, %s2006_s27  }
  0x21   : > { %p50_p12 = scmp.ge.s32.totalorder %s48_s28, 2  ;;  %s55_s29 = sadd.s32 1, %s1621_s11 }
  0x22   : > { %p62_p13 = scmp.ne.s32.totalorder %s1621_s11, %s1617_s10  ;;  %p63_p0 = scmp.eq.s32.totalorder %s1633_s14, 0 }
  0x23   : > { %s2056_s28 = smov (%p50_p12, %s48_s28), 0  ;;  %p1250_p7 = scmp.lt.s32.totalorder %s1633_s14, 2 }
  0x24   : > { %2031 = sst [smem:[#allocation31_spill]] %s2056_s28  ;;  %p64_p3 = por %p63_p0, %p62_p13 }
  0x25   : > { %p1772_p5 = por %p260_p2, %p62_p13  ;;  %s52_s19 = ssub.s32 %s1629_s13, %s2056_s28 }
  0x26   : > { %p53_p9 = scmp.eq.s32.totalorder %s52_s19, 0  ;;  %s1780_s20 = sand.u32 1, %s1621_s11  }
  0x27   : > { %s2032_s16 = scalar_select %p1772_p5, 1, 0 }
  0x28   : > { %p1782_p11 = pnand %p1250_p7, %p64_p3  ;;  %s2016_s23 = sand.u32 1, %s1633_s14  }
  0x29   : > { %2033 = sst [smem:[#allocation32_spill]] %s2032_s16  ;;  %s1177_s26 = sshll.u32 %s1780_s20, 7 }
  0x2a   : > { %s1788_s24 = scalar_select %p53_p9, %s1621_s11, %s55_s29  }
  0x2b   : > { %s1199_s27 = sshll.u32 %s1629_s13, 7  ;;  %s2036_s1 = sld [smem:[#allocation34_spill]] }
  0x2c   : > { %2035 = sst [smem:[#allocation33_spill]] %s1788_s24  ;;  %s369_s7 = scalar_lea.vmem [#allocation9], %s1177_s26 }
  0x2d   : > { %s379_s19 = sshll.u32 %s369_s7, 4  ;;  %s366_s8 = scalar_lea.sflag [#allocation10], %s2016_s23  ;;  %s380_s19 = int_to_ptr.vmem [resolvable:$true] %s379_s19 }
  0x2e   : > { %s2037_s9 = smov 8   ;;  %s2038_s29 = smov 128  }
  0x2f   : > { %s400_s4 = scalar_lea.hbm %s1996_s2, %s1199_s27  ;;  %s327_s23 = sshll.u32 %s2000_s6, 4  ;;  %s328_s23 = int_to_ptr.hbm [resolvable:$true] %s327_s23 }
  0x30   : > { %s401_s18 = sshll.u32 %s400_s4, 4  ;;  %s1638_s12 = smov [#allocation15]   ;;  %s402_s18 = int_to_ptr.hbm [resolvable:$true] %s401_s18 }
  0x31   : > { %s376_s30 = scalar_lea.hbm %s2036_s1, %s1199_s27  ;;  %s1175_s11 = sshll.u32 %s1780_s20, 3 }
  0x32   : > { %s377_s28 = sshll.u32 %s376_s30, 4  ;;  %s393_s30 = scalar_lea.vmem [#allocation11], %s1177_s26  ;;  %s378_s28 = int_to_ptr.hbm [resolvable:$true] %s377_s28 }
  0x33   : > { %1234 = dma.hbm_to_vmem [thread:$0]  (!%p1782_p11), %s378_s28, 2048, %s380_s19, %s366_s8, %s2038_s29, %s2038_s29, %s2037_s9  }
  0x34   : > { %s403_s1 = sshll.u32 %s393_s30, 4  ;;  %s329_s28 = sshll.u32 %s1638_s12, 4  ;;  %s404_s1 = int_to_ptr.vmem [resolvable:$true] %s403_s1  ;;  %s330_s28 = int_to_ptr.vmem [resolvable:$true] %s329_s28 }
  0x35   : > { %1227 = dma.hbm_to_vmem [thread:$0]  (!%p1753_p10), %s328_s23, 2048, %s330_s28, [#allocation16], %s2038_s29, %s2038_s29, %s2037_s9  }
  0x36   : > { %s1176_s26 = sshll.u32 %s1629_s13, 3  ;;  %s350_s4 = scalar_lea.vmem [#allocation6], %s1175_s11 }
  0x37   : > { %s354_s16 = scalar_lea.hbm %s1994_s0, %s1176_s26  ;;  %s358_s30 = sshll.u32 %s350_s4, 4  ;;  %s359_s30 = int_to_ptr.vmem [resolvable:$true] %s358_s30 }
  0x38   : > { %s356_s19 = sshll.u32 %s354_s16, 4  ;;  %s347_s12 = scalar_lea.sflag [#allocation7], %s1780_s20  ;;  %s357_s19 = int_to_ptr.hbm [resolvable:$true] %s356_s19 }
  0x39   : > { %1231 = dma.hbm_to_vmem [thread:$0]  (!%p1782_p11), %s357_s19, 128, %s359_s30, %s347_s12  }
  0x3a   : > { %1237 = dma.hbm_to_vmem [thread:$0]  (!%p1782_p11), %s402_s18, 2048, %s404_s1, %s366_s8, %s2038_s29, %s2038_s29, %s2037_s9  }
  0x3b   : > { %s420_s7 = scalar_lea.hbm %s1997_s3, %s1629_s13  ;;  %s416_s28 = scalar_lea.vmem [#allocation12], %s1780_s20 }
  0x3c   : > { %s424_s26 = sshll.u32 %s416_s28, 4  ;;  %s422_s27 = sshll.u32 %s420_s7, 4  ;;  %s425_s26 = int_to_ptr.vmem [resolvable:$true] %s424_s26  ;;  %s423_s27 = int_to_ptr.hbm [resolvable:$true] %s422_s27 }
  0x3d   : > { %s2039_s11 = sand.u32 1, %s1633_s14   ;;  %433 = sbr.rel (%p1745_p8) target bundleno = 1165 (0x48d), region = 52 }
  0x3e   : > { %s414_s24 = scalar_lea.sflag [#allocation13], %s2039_s11  ;;  %s1838_s16 = sand.u32 (!%p1745_p8), 1, %s1617_s10  }
  0x3f   : > { %1240 = dma.hbm_to_vmem [thread:$0]  (!%p1782_p11), %s423_s27, 16, %s425_s26, %s414_s24  }
  0x40   : > { %s1841_s1 = sshll.u32 (!%p1745_p8), %s1838_s16, 3  ;;  %s436_s8 = scalar_lea.sflag (!%p1745_p8), [#allocation7], %s1838_s16 }
  0x41   : > { %s439_s9 = scalar_lea.vmem (!%p1745_p8), [#allocation6], %s1841_s1 }
  0x42   : > { %1584 = dma.done.wait (%p1732_p4), %s436_s8, 128  }
  0x43   : > { %1586 = vsyncadd (%p1732_p4), %s436_s8, 4294967168  ;;  %s445_s22 = sand.u32 1, %s1723_s15   ;;  %s1185_s20 = sshll.u32 %s1838_s16, 7 }
  0x44   : > { %s446_s21 = scalar_lea.sflag [#allocation10], %s445_s22  ;;  %s1851_s29 = scalar_lea.vmem [#allocation9], %s1185_s20 }
  0x45   : > { %1588 = dma.done.wait (%p1732_p4), %s446_s21, 4096  }
  0x46   : > { %1590 = vsyncadd (%p1732_p4), %s446_s21, 4294963200  ;;  %s1857_s18 = scalar_lea.vmem [#allocation11], %s1185_s20  ;;  %s466_s19 = scalar_lea.sflag [#allocation13], %s445_s22 }
  0x47   : > { %s468_s4 = scalar_lea.vmem [#allocation12], %s1838_s16 }
  0x48   : > { %1592 = dma.done.wait (%p1732_p4), %s466_s19, 16  }
  0x49   : > { %1594 = vsyncadd (%p1732_p4), %s466_s19, 4294967280 }
  0x4a   : > { %1596 = dma.done.wait (%p69_p1), [#allocation13], 6144  }
  0x4b   : > { %1598 = vsyncadd (%p69_p1), [#allocation13], 4294961152 }
  0x4c   : > { %1600 = dma.done.wait (%p69_p1), [#allocation16], 2048  }
  0x4d   : > { %1602 = vsyncadd (%p69_p1), [#allocation16], 4294965248  ;;  %v617_v0 = vld [vmem:[#allocation14 + $0xf8] sm:$0xff]  ;;  %v616_v1 = vld [vmem:[#allocation14 + $0xf0] sm:$0xff]  ;;  %vm581_vm0 = vcmask 7168   ;;  %s2040_s7 = sld [smem:[#allocation29_spill]] }
  0x4e   : > { %623 = vmatpush.msra.mxu1 %v617_v0  ;;  %v615_v2 = vld [vmem:[#allocation14 + $0xe8] sm:$0xff]  ;;  %v614_v3 = vld [vmem:[#allocation14 + $0xe0] sm:$0xff]  ;;  %v613_v4 = vld [vmem:[#allocation14 + $0xd8] sm:$0xff]  ;;  %s2042_s24 = sld [smem:[#allocation38_spill]]  ;;  %s941_s21 = scalar_lea.sflag [#allocation19], %s1838_s16 }
  0x4f   : > { %v612_v5 = vld [vmem:[#allocation14 + $0xd0] sm:$0xff]  ;;  %v611_v6 = vld [vmem:[#allocation14 + $0xc8] sm:$0xff]  ;;  %v610_v7 = vld [vmem:[#allocation14 + $0xc0] sm:$0xff] }
  0x50   : > { %624 = vmatpush.msra.mxu1 %v616_v1  ;;  %v609_v8 = vld [vmem:[#allocation14 + $0xb8] sm:$0xff]  ;;  %v608_v9 = vld [vmem:[#allocation14 + $0xb0] sm:$0xff]  ;;  %v607_v10 = vld [vmem:[#allocation14 + $0xa8] sm:$0xff] }
  0x51   : > { %v606_v11 = vld [vmem:[#allocation14 + $0xa0] sm:$0xff]  ;;  %v605_v12 = vld [vmem:[#allocation14 + $0x98] sm:$0xff]  ;;  %v604_v13 = vld [vmem:[#allocation14 + $0x90] sm:$0xff] }
  0x52   : > { %625 = vmatpush.msra.mxu1 %v615_v2  ;;  %v603_v14 = vld [vmem:[#allocation14 + $0x88] sm:$0xff]  ;;  %v602_v15 = vld [vmem:[#allocation14 + $0x80] sm:$0xff]  ;;  %v588_v19 = vld [vmem:[%s1851_s29 + $0x18] sm:$0xff] }
  0x53   : > { %v585_v16 = vld [vmem:[%s1851_s29] sm:$0xff]  ;;  %v586_v17 = vld [vmem:[%s1851_s29 + $0x8] sm:$0xff]  ;;  %v587_v18 = vld [vmem:[%s1851_s29 + $0x10] sm:$0xff]  ;;  %s1195_s26 = sshll.u32 %s2040_s7, 3 }
  0x54   : > { %626 = vmatpush.msra.mxu1 %v614_v3  ;;  %v589_v20 = vld [vmem:[%s1851_s29 + $0x20] sm:$0xff]  ;;  %v590_v21 = vld [vmem:[%s1851_s29 + $0x28] sm:$0xff]  ;;  %v591_v22 = vld [vmem:[%s1851_s29 + $0x30] sm:$0xff]  ;;  %s965_s8 = scalar_lea.hbm %s2042_s24, %s1195_s26  ;;  %s1523_s15 = scalar_lea.hbm %s2042_s24, 16 }
  0x55   : > { %v592_v23 = vld [vmem:[%s1851_s29 + $0x38] sm:$0xff]  ;;  %v593_v24 = vld [vmem:[%s1851_s29 + $0x40] sm:$0xff]  ;;  %v594_v25 = vld [vmem:[%s1851_s29 + $0x48] sm:$0xff]  ;;  %s969_s20 = sshll.u32 %s965_s8, 4  ;;  %s970_s20 = int_to_ptr.hbm [resolvable:$true] %s969_s20 }
  0x56   : > { %627 = vmatpush.msra.mxu1 %v613_v4  ;;  %v595_v26 = vld [vmem:[%s1851_s29 + $0x50] sm:$0xff]  ;;  %v596_v27 = vld [vmem:[%s1851_s29 + $0x58] sm:$0xff]  ;;  %v597_v28 = vld [vmem:[%s1851_s29 + $0x60] sm:$0xff] }
  0x57   : > { %v598_v29 = vld [vmem:[%s1851_s29 + $0x68] sm:$0xff]  ;;  %v599_v30 = vld [vmem:[%s1851_s29 + $0x70] sm:$0xff]  ;;  %v600_v31 = vld [vmem:[%s1851_s29 + $0x78] sm:$0xff]  ;;  %s1517_s29 = sshra.s32 %s970_s20, 4  ;;  %s1518_s29 = int_to_ptr.hbm [resolvable:$true] %s1517_s29 }
  0x58   : > { %628 = vmatpush.msra.mxu1 %v612_v5  ;;  %v555_v32 = vld [vmem:[#allocation14 + $0x78] sm:$0xff]  ;;  %v554_v33 = vld [vmem:[#allocation14 + $0x70] sm:$0xff]  ;;  %v553_v34 = vld [vmem:[#allocation14 + $0x68] sm:$0xff]  ;;  %p1524_p8 = scmp.lt.s32.totalorder %s1518_s29, %s2042_s24 }
  0x59   : > { %560 = vmatpush.msra.mxu0 %v555_v32  ;;  %v552_v36 = vld [vmem:[#allocation14 + $0x60] sm:$0xff]  ;;  %v551_v37 = vld [vmem:[#allocation14 + $0x58] sm:$0xff]  ;;  %v550_v38 = vld [vmem:[#allocation14 + $0x50] sm:$0xff] }
  0x5a   : > { %629 = vmatpush.msra.mxu1 %v611_v6  ;;  %v549_v39 = vld [vmem:[#allocation14 + $0x48] sm:$0xff]  ;;  %v548_v41 = vld [vmem:[#allocation14 + $0x40] sm:$0xff]  ;;  %v547_v42 = vld [vmem:[#allocation14 + $0x38] sm:$0xff] }
  0x5b   : > { %561 = vmatpush.msra.mxu0 %v554_v33  ;;  %v546_v43 = vld [vmem:[#allocation14 + $0x30] sm:$0xff]  ;;  %v545_v44 = vld [vmem:[#allocation14 + $0x28] sm:$0xff]  ;;  %v544_v46 = vld [vmem:[#allocation14 + $0x20] sm:$0xff] }
  0x5c   : > { %630 = vmatpush.msra.mxu1 %v610_v7  ;;  %v543_v47 = vld [vmem:[#allocation14 + $0x18] sm:$0xff]  ;;  %v542_v48 = vld [vmem:[#allocation14 + $0x10] sm:$0xff]  ;;  %v541_v49 = vld [vmem:[#allocation14 + $0x8] sm:$0xff] }
  0x5d   : > { %562 = vmatpush.msra.mxu0 %v553_v34  ;;  %v540_v51 = vld [vmem:[#allocation14] sm:$0xff]  ;;  %v539_v52 = vld [vmem:[%s439_s9] sm:$0xff]  ;;  %v1312_v0 = vld [vmem:[%s1999_s5 + $0x1] ss:$0 sm:$0xff]  ;;  %s532_s9 = scalar_lea.vmem [#allocation18], %s1841_s1 }
  0x5e   : > { %631 = vmatpush.msra.mxu1 %v609_v8  ;;  %v706_v33 = vld [vmem:[#allocation14 + $0x108] sm:$0xff]  ;;  %s967_s22 = sshll.u32 %s532_s9, 4  ;;  %s968_s22 = int_to_ptr.vmem [resolvable:$true] %s967_s22 }
  0x5f   : > { %563 = vmatpush.msra.mxu0 %v552_v36 }
  0x60   : > { %632 = vmatpush.msra.mxu1 %v608_v9 }
  0x61   : > { %564 = vmatpush.msra.mxu0 %v551_v37  ;;  %v705_v37 = vld [vmem:[#allocation14 + $0x100] sm:$0xff] }
  0x62   : > { %633 = vmatpush.msra.mxu1 %v607_v10 }
  0x63   : > { %565 = vmatpush.msra.mxu0 %v550_v38  ;;  %v688_v38 = vld [vmem:[%s1857_s18] sm:$0xff] }
  0x64   : > { %634 = vmatpush.msra.mxu1 %v606_v11  ;;  %v720_v11 = vld [vmem:[#allocation14 + $0x178] sm:$0xff] }
  0x65   : > { %566 = vmatpush.msra.mxu0 %v549_v39  ;;  %726 = vmatpush.msra.mxu2 %v720_v11  ;;  %v689_v39 = vld [vmem:[%s1857_s18 + $0x8] sm:$0xff] }
  0x66   : > { %635 = vmatpush.msra.mxu1 %v605_v12  ;;  %v719_v12 = vld [vmem:[#allocation14 + $0x170] sm:$0xff] }
  0x67   : > { %567 = vmatpush.msra.mxu0 %v548_v41  ;;  %727 = vmatpush.msra.mxu2 %v719_v12  ;;  %v692_v41 = vld [vmem:[%s1857_s18 + $0x20] sm:$0xff] }
  0x68   : > { %636 = vmatpush.msra.mxu1 %v604_v13  ;;  %v718_v13 = vld [vmem:[#allocation14 + $0x168] sm:$0xff] }
  0x69   : > { %568 = vmatpush.msra.mxu0 %v547_v42  ;;  %728 = vmatpush.msra.mxu2 %v718_v13  ;;  %v693_v42 = vld [vmem:[%s1857_s18 + $0x28] sm:$0xff] }
  0x6a   : > { %637 = vmatpush.msra.mxu1 %v603_v14 }
  0x6b   : > { %569 = vmatpush.msra.mxu0 %v546_v43  ;;  %v694_v43 = vld [vmem:[%s1857_s18 + $0x30] sm:$0xff] }
  0x6c   : > { %638 = vmatpush.msra.mxu1 %v602_v15  ;;  %v717_v15 = vld [vmem:[#allocation14 + $0x160] sm:$0xff] }
  0x6d   : > { %639 = vmatmul.f32.vlgmr.msra.gmra.mxu1 %v585_v16  ;;  %570 = vmatpush.msra.mxu0 %v545_v44  ;;  %v716_v16 = vld [vmem:[#allocation14 + $0x158] sm:$0xff] }
  0x6e   : > { %729 = vmatpush.msra.mxu2 %v717_v15  ;;  %v695_v44 = vld [vmem:[%s1857_s18 + $0x38] sm:$0xff] }
  0x6f   : > { %571 = vmatpush.msra.mxu0 %v544_v46  ;;  %v697_v46 = vld [vmem:[%s1857_s18 + $0x48] sm:$0xff] }
  0x70   : > { %730 = vmatpush.msra.mxu2 %v716_v16 }
  0x71   : > { %572 = vmatpush.msra.mxu0 %v543_v47  ;;  %v698_v47 = vld [vmem:[%s1857_s18 + $0x50] sm:$0xff] }
  0x73   : > { %573 = vmatpush.msra.mxu0 %v542_v48  ;;  %v699_v48 = vld [vmem:[%s1857_s18 + $0x58] sm:$0xff] }
  0x75   : > { %642 = vmatmul.f32.gmra.mxu1 %v586_v17  ;;  %574 = vmatpush.msra.mxu0 %v541_v49  ;;  %v700_v49 = vld [vmem:[%s1857_s18 + $0x60] sm:$0xff] }
  0x77   : > { %575 = vmatpush.msra.mxu0 %v540_v51  ;;  %v702_v51 = vld [vmem:[%s1857_s18 + $0x70] sm:$0xff] }
  0x78   : > { %576 = vmatmul.f32.vlgmr.msra.gmra.mxu0 %v539_v52  ;;  %v1314_v52 = vld [vmem:[%s468_s4] ss:$0 sm:$0xff] }
  0x7d   : > { %645 = vmatmul.f32.gmra.mxu1 %v587_v18  ;;  %v715_v18 = vld [vmem:[#allocation14 + $0x150] sm:$0xff] }
  0x7e   : > { %731 = vmatpush.msra.mxu2 %v715_v18 }
  0x85   : > { %648 = vmatmul.f32.gmra.mxu1 %v588_v19  ;;  %v714_v19 = vld [vmem:[#allocation14 + $0x148] sm:$0xff] }
  0x86   : > { %732 = vmatpush.msra.mxu2 %v714_v19 }
  0x8d   : > { %651 = vmatmul.f32.gmra.mxu1 %v589_v20 }
  0x95   : > { %654 = vmatmul.f32.gmra.mxu1 %v590_v21  ;;  %v713_v21 = vld [vmem:[#allocation14 + $0x140] sm:$0xff] }
  0x96   : > { %733 = vmatpush.msra.mxu2 %v713_v21 }
  0x9d   : > { %657 = vmatmul.f32.gmra.mxu1 %v591_v22  ;;  %v712_v22 = vld [vmem:[#allocation14 + $0x138] sm:$0xff] }
  0x9e   : > { %734 = vmatpush.msra.mxu2 %v712_v22 }
  0xa5   : > { %660 = vmatmul.f32.gmra.mxu1 %v592_v23 }
  0xad   : > { %663 = vmatmul.f32.gmra.mxu1 %v593_v24  ;;  %v711_v24 = vld [vmem:[#allocation14 + $0x130] sm:$0xff] }
  0xae   : > { %735 = vmatpush.msra.mxu2 %v711_v24 }
  0xb5   : > { %666 = vmatmul.f32.gmra.mxu1 %v594_v25  ;;  %v710_v25 = vld [vmem:[#allocation14 + $0x128] sm:$0xff] }
  0xb6   : > { %736 = vmatpush.msra.mxu2 %v710_v25 }
  0xbd   : > { %669 = vmatmul.f32.gmra.mxu1 %v595_v26 }
  0xc5   : > { %672 = vmatmul.f32.gmra.mxu1 %v596_v27  ;;  %v709_v27 = vld [vmem:[#allocation14 + $0x120] sm:$0xff] }
  0xc6   : > { %737 = vmatpush.msra.mxu2 %v709_v27 }
  0xcd   : > { %675 = vmatmul.f32.gmra.mxu1 %v597_v28  ;;  %v708_v28 = vld [vmem:[#allocation14 + $0x118] sm:$0xff] }
  0xce   : > { %738 = vmatpush.msra.mxu2 %v708_v28 }
  0xd5   : > { %678 = vmatmul.f32.gmra.mxu1 %v598_v29 }
  0xdd   : > { %681 = vmatmul.f32.gmra.mxu1 %v599_v30  ;;  %v1313_v30 = vld [vmem:[%s1999_s5] ss:$0 sm:$0xff] }
  0xe5   : > { %684 = vmatmul.f32.gmra.mxu1 %v600_v31  ;;  %v707_v31 = vld [vmem:[#allocation14 + $0x110] sm:$0xff] }
  0xe6   : > { %739 = vmatpush.msra.mxu2 %v707_v31 }
  0xe8   : > { %740 = vmatpush.msra.mxu2 %v706_v33 }
  0xea   : > { %v1888_v35 = vpop.f32.mrf.mxu1  ;;  %741 = vmatpush.msra.mxu2 %v705_v37 }
  0xeb   : > { %v641_v34 = vadd.f32 %v1312_v0, %v1888_v35  ;;  %742 = vmatmul.f32.vlgmr.msra.gmra.mxu2 %v688_v38  ;;  %v691_v35 = vld [vmem:[%s1857_s18 + $0x18] sm:$0xff] }
  0xf2   : > { %v1890_v40 = vpop.f32.mrf.mxu1 }
  0xf3   : > { %v644_v29 = vadd.f32 %v1312_v0, %v1890_v40  ;;  %745 = vmatmul.f32.gmra.mxu2 %v689_v39  ;;  %v690_v40 = vld [vmem:[%s1857_s18 + $0x10] sm:$0xff] }
  0xf5   : > { %v577_v32 = vpop.f32.mrf.mxu0 }
  0xf6   : > { %v578_v36 = vadd.f32 %v1313_v30, %v577_v32 }
  0xfa   : > { %v1892_v45 = vpop.f32.mrf.mxu1 }
  0xfb   : > { %v647_v26 = vadd.f32 %v1312_v0, %v1892_v45  ;;  %748 = vmatmul.f32.gmra.mxu2 %v690_v40  ;;  %v696_v45 = vld [vmem:[%s1857_s18 + $0x40] sm:$0xff] }
  0xfc   : > { %v909_v40 = vld [vmem:[#allocation15 + $0x78] sm:$0xff] }
 0x102   : > { %v649_v50 = vpop.f32.mrf.mxu1 }
 0x103   : > { %v650_v23 = vadd.f32 %v1312_v0, %v649_v50  ;;  %751 = vmatmul.f32.gmra.mxu2 %v691_v35  ;;  %v701_v50 = vld [vmem:[%s1857_s18 + $0x68] sm:$0xff]  ;;  %v908_v35 = vld [vmem:[#allocation15 + $0x70] sm:$0xff] }
 0x10a   : > { %v652_v53 = vpop.f32.mrf.mxu1 }
 0x10b   : > { %v653_v20 = vadd.f32 %v1312_v0, %v652_v53  ;;  %754 = vmatmul.f32.gmra.mxu2 %v692_v41  ;;  %v907_v41 = vld [vmem:[#allocation15 + $0x68] sm:$0xff] }
 0x112   : > { %v655_v54 = vpop.f32.mrf.mxu1 }
 0x113   : > { %v656_v17 = vadd.f32 %v1312_v0, %v655_v54  ;;  %757 = vmatmul.f32.gmra.mxu2 %v693_v42 }
 0x11a   : > { %v658_v55 = vpop.f32.mrf.mxu1 }
 0x11b   : > { %v659_v14 = vadd.f32 %v1312_v0, %v658_v55  ;;  %760 = vmatmul.f32.gmra.mxu2 %v694_v43 }
 0x122   : > { %v661_v56 = vpop.f32.mrf.mxu1 }
 0x123   : > { %v662_v10 = vadd.f32 %v1312_v0, %v661_v56  ;;  %763 = vmatmul.f32.gmra.mxu2 %v695_v44  ;;  %v703_v56 = vld [vmem:[%s1857_s18 + $0x78] sm:$0xff]  ;;  %v906_v44 = vld [vmem:[#allocation15 + $0x60] sm:$0xff]  ;;  %s1519_s18 = scalar_lea.hbm %s1518_s29, 8 }
 0x124   : > { %p1520_p1 = scmp.ne.s32.totalorder %s1518_s29, %s1519_s18  ;;  %p1525_p10 = scmp.lt.s32.totalorder %s1523_s15, %s1519_s18 }
 0x126   : > { %p1521_p2 = pnand %p1520_p1, %p1772_p5  ;;  %p1526_p11 = por %p1525_p10, %p1524_p8 }
 0x128   : > { %p1522_p4 = pneg %p1521_p2 }
 0x12a   : > { %v664_v57 = vpop.f32.mrf.mxu1  ;;  %p1527_p12 = pnand %p1526_p11, %p1522_p4 }
 0x12b   : > { %v665_v9 = vadd.f32 %v1312_v0, %v664_v57  ;;  %766 = vmatmul.f32.gmra.mxu2 %v696_v45 }
 0x132   : > { %v667_v58 = vpop.f32.mrf.mxu1 }
 0x133   : > { %v668_v8 = vadd.f32 %v1312_v0, %v667_v58  ;;  %769 = vmatmul.f32.gmra.mxu2 %v697_v46  ;;  %v905_v46 = vld [vmem:[#allocation15 + $0x58] sm:$0xff] }
 0x13a   : > { %v670_v59 = vpop.f32.mrf.mxu1 }
 0x13b   : > { %v671_v7 = vadd.f32 %v1312_v0, %v670_v59  ;;  %772 = vmatmul.f32.gmra.mxu2 %v698_v47  ;;  %v904_v47 = vld [vmem:[#allocation15 + $0x50] sm:$0xff] }
 0x142   : > { %v673_v60 = vpop.f32.mrf.mxu1 }
 0x143   : > { %v674_v6 = vadd.f32 %v1312_v0, %v673_v60  ;;  %775 = vmatmul.f32.gmra.mxu2 %v699_v48  ;;  %v1639_v60 = vmov -inf   ;;  %v903_v48 = vld [vmem:[#allocation15 + $0x48] sm:$0xff] }
 0x144   : > { %582 = vst.msk [vmem:[#allocation3] sm:$0xff] %vm581_vm0, %v1639_v60 }
 0x14a   : > { %v676_v61 = vpop.f32.mrf.mxu1 }
 0x14b   : > { %v677_v5 = vadd.f32 %v1312_v0, %v676_v61  ;;  %778 = vmatmul.f32.gmra.mxu2 %v700_v49  ;;  %v902_v49 = vld [vmem:[#allocation15 + $0x40] sm:$0xff] }
 0x152   : > { %v679_v62 = vpop.f32.mrf.mxu1 }
 0x153   : > { %v680_v4 = vadd.f32 %v1312_v0, %v679_v62  ;;  %781 = vmatmul.f32.gmra.mxu2 %v701_v50 }
 0x15a   : > { %v682_v63 = vpop.f32.mrf.mxu1 }
 0x15b   : > { %v683_v3 = vadd.f32 %v1312_v0, %v682_v63  ;;  %784 = vmatmul.f32.gmra.mxu2 %v702_v51  ;;  %v901_v51 = vld [vmem:[#allocation15 + $0x38] sm:$0xff] }
 0x162   : > { %v685_v1 = vpop.f32.mrf.mxu1 }
 0x163   : > { %v686_v2 = vadd.f32 %v1312_v0, %v685_v1  ;;  %787 = vmatmul.f32.gmra.mxu2 %v703_v56 }
 0x165   : > { %796 = vmatpush.xpose.msra.mxu3 %v686_v2  ;;  %v1640_v2 = vmov 0  }
 0x166   : > { %1309 = vset.pattern.permute.xlu0 %v1640_v2  ;;  %1310 = vset.pattern.permute.xlu1 %v1640_v2 }
 0x167   : > { %1311 = vset.pattern.permute.xlu2 %v1640_v2 }
 0x169   : > { %797 = vmatpush.xpose.msra.mxu3 %v683_v3 }
 0x16d   : > { %798 = vmatpush.xpose.msra.mxu3 %v680_v4  ;;  %v1641_v4 = vmov 0.0  }
 0x16e   : > { %v1922_v54 = vpop.f32.mrf.mxu2  ;;  %583 = vst.msk [vmem:[#allocation4] sm:$0xff] %vm581_vm0, %v1641_v4  ;;  %v894_v4 = vld [vmem:[#allocation15] sm:$0xff] }
 0x171   : > { %799 = vmatpush.xpose.msra.mxu3 %v677_v5 }
 0x175   : > { %800 = vmatpush.xpose.msra.mxu3 %v674_v6  ;;  %v831_v39 = vld [vmem:[#allocation4] sm:$0xff] }
 0x176   : > { %v746_v57 = vpop.f32.mrf.mxu2 }
 0x179   : > { %801 = vmatpush.xpose.msra.mxu3 %v671_v7 }
 0x17d   : > { %802 = vmatpush.xpose.msra.mxu3 %v668_v8  ;;  %v816_v8 = vld [vmem:[#allocation3] sm:$0xff] }
 0x17e   : > { %v749_v58 = vpop.f32.mrf.mxu2 }
 0x181   : > { %803 = vmatpush.xpose.msra.mxu3 %v665_v9 }
 0x185   : > { %804 = vmatpush.xpose.msra.mxu3 %v662_v10 }
 0x186   : > { %v752_v59 = vpop.f32.mrf.mxu2 }
 0x189   : > { %805 = vmatpush.xpose.msra.mxu3 %v659_v14  ;;  %v1315_v14 = vld [vmem:[%s1999_s5 + $0x2] ss:$0 sm:$0xff] }
 0x18a   : > { %v753_v28 = vadd.f32 %v1315_v14, %v752_v59  ;;  %v747_v30 = vadd.f32 %v1315_v14, %v746_v57  ;;  %v744_v31 = vadd.f32 %v1315_v14, %v1922_v54  ;;  %v898_v54 = vld [vmem:[#allocation15 + $0x20] sm:$0xff]  ;;  %v897_v57 = vld [vmem:[#allocation15 + $0x18] sm:$0xff]  ;;  %v896_v59 = vld [vmem:[#allocation15 + $0x10] sm:$0xff] }
 0x18d   : > { %806 = vmatpush.xpose.msra.mxu3 %v656_v17 }
 0x18e   : > { %v755_v61 = vpop.f32.mrf.mxu2 }
 0x18f   : > { %v756_v27 = vadd.f32 %v1315_v14, %v755_v61 }
 0x191   : > { %807 = vmatpush.xpose.msra.mxu3 %v653_v20 }
 0x195   : > { %808 = vmatpush.xpose.msra.mxu3 %v650_v23 }
 0x196   : > { %v758_v62 = vpop.f32.mrf.mxu2 }
 0x199   : > { %809 = vmatpush.xpose.msra.mxu3 %v647_v26  ;;  %v759_v26 = vadd.f32 %v1315_v14, %v758_v62 }
 0x19d   : > { %810 = vmatpush.xpose.msra.mxu3 %v644_v29  ;;  %v750_v29 = vadd.f32 %v1315_v14, %v749_v58 }
 0x19e   : > { %v761_v63 = vpop.f32.mrf.mxu2 }
 0x19f   : > { %v762_v25 = vadd.f32 %v1315_v14, %v761_v63  ;;  %v895_v63 = vld [vmem:[#allocation15 + $0x8] sm:$0xff] }
 0x1a1   : > { %811 = vmatpush.xpose.msra.mxu3 %v641_v34 }
 0x1a4   : > { %812 = vmatmul.f32.vlgmr.msra.gmra.mxu3 %v578_v36 }
 0x1a6   : > { %v764_v0 = vpop.f32.mrf.mxu2 }
 0x1a7   : > { %v765_v24 = vadd.f32 %v1315_v14, %v764_v0 }
 0x1ae   : > { %v767_v1 = vpop.f32.mrf.mxu2 }
 0x1af   : > { %v768_v23 = vadd.f32 %v1315_v14, %v767_v1 }
 0x1b6   : > { %v770_v3 = vpop.f32.mrf.mxu2 }
 0x1b7   : > { %v771_v22 = vadd.f32 %v1315_v14, %v770_v3 }
 0x1be   : > { %v773_v5 = vpop.f32.mrf.mxu2 }
 0x1bf   : > { %v774_v21 = vadd.f32 %v1315_v14, %v773_v5 }
 0x1c6   : > { %v776_v6 = vpop.f32.mrf.mxu2 }
 0x1c7   : > { %v777_v20 = vadd.f32 %v1315_v14, %v776_v6 }
 0x1ce   : > { %v779_v7 = vpop.f32.mrf.mxu2 }
 0x1cf   : > { %v780_v19 = vadd.f32 %v1315_v14, %v779_v7 }
 0x1d6   : > { %v782_v12 = vpop.f32.mrf.mxu2 }
 0x1d7   : > { %v783_v18 = vadd.f32 %v1315_v14, %v782_v12 }
 0x1de   : > { %v785_v13 = vpop.f32.mrf.mxu2 }
 0x1df   : > { %v786_v16 = vadd.f32 %v1315_v14, %v785_v13 }
 0x1e6   : > { %v788_v15 = vpop.f32.mrf.mxu2 }
 0x1e7   : > { %v789_v17 = vadd.f32 %v1315_v14, %v788_v15 }
 0x1e9   : > { %838 = vmatpush.msrb.mxu0 %v789_v17 }
 0x1eb   : > { %839 = vmatpush.msrb.mxu0 %v786_v16 }
 0x1ed   : > { %840 = vmatpush.msrb.mxu0 %v783_v18 }
 0x1ef   : > { %841 = vmatpush.msrb.mxu0 %v780_v19 }
 0x1f1   : > { %842 = vmatpush.msrb.mxu0 %v777_v20 }
 0x1f3   : > { %843 = vmatpush.msrb.mxu0 %v774_v21 }
 0x1f5   : > { %844 = vmatpush.msrb.mxu0 %v771_v22 }
 0x1f7   : > { %845 = vmatpush.msrb.mxu0 %v768_v23 }
 0x1f9   : > { %846 = vmatpush.msrb.mxu0 %v765_v24 }
 0x1fb   : > { %847 = vmatpush.msrb.mxu0 %v762_v25 }
 0x1fd   : > { %848 = vmatpush.msrb.mxu0 %v759_v26 }
 0x1ff   : > { %849 = vmatpush.msrb.mxu0 %v756_v27 }
 0x201   : > { %850 = vmatpush.msrb.mxu0 %v753_v28 }
 0x203   : > { %851 = vmatpush.msrb.mxu0 %v750_v29 }
 0x205   : > { %852 = vmatpush.msrb.mxu0 %v747_v30 }
 0x207   : > { %853 = vmatpush.msrb.mxu0 %v744_v31 }
 0x209   : > { %914 = vmatpush.msra.mxu0 %v909_v40 }
 0x20b   : > { %915 = vmatpush.msra.mxu0 %v908_v35 }
 0x20d   : > { %916 = vmatpush.msra.mxu0 %v907_v41 }
 0x20f   : > { %917 = vmatpush.msra.mxu0 %v906_v44 }
 0x211   : > { %918 = vmatpush.msra.mxu0 %v905_v46 }
 0x213   : > { %919 = vmatpush.msra.mxu0 %v904_v47 }
 0x215   : > { %920 = vmatpush.msra.mxu0 %v903_v48 }
 0x217   : > { %921 = vmatpush.msra.mxu0 %v902_v49 }
 0x219   : > { %922 = vmatpush.msra.mxu0 %v901_v51 }
 0x227   : > { %v813_v53 = vpop.f32.mrf.mxu3 }
 0x228   : > { %v1924_v55 = vadd.f32 %v1314_v52, %v813_v53  ;;  %v900_v52 = vld [vmem:[#allocation15 + $0x30] sm:$0xff]  ;;  %v899_v53 = vld [vmem:[#allocation15 + $0x28] sm:$0xff] }
 0x229   : > { %923 = vmatpush.msra.mxu0 %v900_v52 }
 0x22a   : > { %817 = vmax.xlane.f32.xlu0 %v1924_v55 }
 0x22b   : > { %924 = vmatpush.msra.mxu0 %v899_v53 }
 0x22d   : > { %925 = vmatpush.msra.mxu0 %v898_v54 }
 0x22f   : > { %926 = vmatpush.msra.mxu0 %v897_v57 }
 0x231   : > { %927 = vmatpush.msra.mxu0 %v896_v59 }
 0x233   : > { %928 = vmatpush.msra.mxu0 %v895_v63 }
 0x235   : > { %929 = vmatpush.msra.mxu0 %v894_v4 }
 0x29d   : > { %v818_v9 = vpop.xlane.xlu0 %817 }
 0x29e   : > { %v819_v10 = vmax.f32 %v816_v8, %v818_v9 }
 0x2a0   : > { %v820_v11 = vsub.f32 %v816_v8, %v819_v10  ;;  %867 = vst.msk [vmem:[#allocation3] sm:$0xff] %vm581_vm0, %v819_v10  ;;  %825 = vperm.xlu0 %1309, %v819_v10  }
 0x2a2   : > { %v821_v37 = vmul.f32 1.442695, %v820_v11 }
 0x312   : > { %v826_v32 = vpop.permute.xlu0 %825 }
 0x313   : > { %v828_v33 = vsub.f32 %v1924_v55, %v826_v32 }
 0x315   : > { %v829_v34 = vmul.f32 1.442695, %v828_v33 }
 0x317   : > { %1317 = vpow2.f32 %v829_v34 }
 0x318   : > { %1319 = vpow2.f32 %v821_v37 }
 0x31d   : > { %v1318_v36 = vpop.eup %1317 }
 0x31e   : > { %833 = vadd.xlane.f32.xlu1 %v1318_v36  ;;  %854 = vmatmul.f32.vlgmr.msrb.gmra.mxu0 %v1318_v36  ;;  %v1320_v38 = vpop.eup %1319 }
 0x31f   : > { %v832_v42 = vmul.f32 %v1320_v38, %v831_v39 }
 0x337   : > { %861 = vperm.xlu1 %1310, %v1320_v38  }
 0x391   : > { %v834_v43 = vpop.xlane.xlu1 %833 }
 0x392   : > { %v835_v45 = vadd.f32 %v834_v43, %v832_v42 }
 0x394   : > { %837 = vst.msk [vmem:[#allocation4] sm:$0xff] %vm581_vm0, %v835_v45 }
 0x39b   : > { %v872_v50 = vld [vmem:[#allocation4] sm:$0xff]  ;;  %v855_v7 = vpop.f32.mrf.mxu0 }
 0x39c   : > { %1321 = vrcp.f32 %v872_v50  ;;  %v884_v60 = vand.u32 2147483648, %v872_v50  ;;  %v882_v62 = vand.u32 2147483647, %v872_v50  ;;  %vm878_vm2 = vweird.f32 %v872_v50 }
 0x39e   : > { %v885_v1 = vor.u32 1.1754944e-38, %v884_v60  ;;  %vm883_vm4 = vcmp.eq.f32.partialorder %v882_v62, 8.507059e+37 }
 0x3a2   : > { %v1322_v55 = vpop.eup %1321 }
 0x3a3   : > { %v874_v56 = vmul.f32 %v1322_v55, %v872_v50  ;;  %vm879_vm1 = vweird.f32 %v1322_v55 }
 0x3a4   : > { %vm880_vm3 = vmor %vm878_vm2, %vm879_vm1 }
 0x3a5   : > { %v875_v58 = vsub.f32 1.0, %v874_v56 }
 0x3a7   : > { %v876_v61 = vmul.f32 %v1322_v55, %v875_v58 }
 0x3a9   : > { %v877_v0 = vadd.f32 %v1322_v55, %v876_v61  ;;  %v862_v5 = vpop.permute.xlu1 %861 }
 0x3aa   : > { %v864_v6 = vmul.f32 0.0, %v862_v5 }
 0x3ab   : > { %v881_v2 = vsel %vm880_vm3, %v1322_v55, %v877_v0 }
 0x3ac   : > { %v886_v3 = vsel %vm883_vm4, %v885_v1, %v881_v2  ;;  %v865_v8 = vadd.f32 %v864_v6, %v855_v7 }
 0x3ad   : > { %889 = vperm.xlu2 %1311, %v886_v3  }
 0x407   : > { %v890_v9 = vpop.permute.xlu2 %889 }
 0x408   : > { %v892_v10 = vmul.f32 %v890_v9, %v865_v8 }
 0x40a   : > { %893 = vst [vmem:[%s532_s9] sm:$0xff] %v892_v10  ;;  %930 = vmatmul.f32.vlgmr.msra.gmra.mxu0 %v892_v10 }
 0x40b   : > { %1530 = shalt.err (!%p1527_p12)
}
 0x40c   : > { %1218 = dma.vmem_to_hbm [thread:$0]  (%p1772_p5), %s968_s22, 128, %s970_s20, %s941_s21  }
 0x40d   : > { %s2043_s23 = sld [smem:[#allocation37_spill]]  ;;  %s525_s9 = scalar_lea.vmem [#allocation17], %s1841_s1 }
 0x40e   : > { %s2044_s8 = sld [smem:[#allocation36_spill]]  ;;  %s953_s29 = sshll.u32 %s525_s9, 4  ;;  %s954_s29 = int_to_ptr.vmem [resolvable:$true] %s953_s29 }
 0x40f   : > { %s936_s19 = scalar_lea.sflag [#allocation8], %s1838_s16 }
 0x413   : > { %s951_s7 = scalar_lea.hbm %s2043_s23, %s1195_s26  ;;  %s1551_s21 = scalar_lea.hbm %s2043_s23, 16 }
 0x414   : > { %v1316_v11 = vld [vmem:[%s2044_s8] ss:$0 sm:$0xff]  ;;  %s955_s18 = sshll.u32 %s951_s7, 4  ;;  %s956_s18 = int_to_ptr.hbm [resolvable:$true] %s955_s18 }
 0x415   : > { %s1545_s4 = sshra.s32 %s956_s18, 4  ;;  %s1546_s4 = int_to_ptr.hbm [resolvable:$true] %s1545_s4 }
 0x416   : > { %s1547_s22 = scalar_lea.hbm %s1546_s4, 8  ;;  %p1552_p7 = scmp.lt.s32.totalorder %s1546_s4, %s2043_s23 }
 0x417   : > { %p1548_p13 = scmp.ne.s32.totalorder %s1546_s4, %s1547_s22  ;;  %p1553_p9 = scmp.lt.s32.totalorder %s1551_s21, %s1547_s22 }
 0x419   : > { %p1549_p0 = pnand %p1548_p13, %p1772_p5  ;;  %p1554_p1 = por %p1553_p9, %p1552_p7 }
 0x41b   : > { %p1550_p3 = pneg %p1549_p0 }
 0x41d   : > { %p1555_p2 = pnand %p1554_p1, %p1550_p3 }
 0x487   : > { %v931_v12 = vpop.f32.mrf.mxu0 }
 0x488   : > { %v932_v13 = vadd.f32 %v1316_v11, %v931_v12 }
 0x48a   : > { %934 = vst [vmem:[%s525_s9] sm:$0xff] %v932_v13 }
 0x48b   : > { %1558 = shalt.err (!%p1555_p2)
}
 0x48c   : > { %1217 = dma.vmem_to_hbm [thread:$0]  (%p1772_p5), %s954_s29, 128, %s956_s18, %s936_s19  }
 0x48d PF: > { %s2045_s16 = sld [smem:[#allocation27_spill]]  ;;  %p2047_p4 = scmp.ge.s32.totalorder %s1633_s14, 2 }
 0x48f   : > { %p1242_p8 = pnand %p2047_p4, %p1737_p6 }
 0x491   : > { %p1243_p10 = pneg %p1242_p8 }
 0x493   : > { %s981_s30 = sand.u32 1, %s2045_s16  }
 0x494   : > { %s982_s12 = scalar_lea.sflag [#allocation8], %s981_s30 }
 0x495   : > { %1604 = dma.done.wait (%p1243_p10), %s982_s12, 128  }
 0x496   : > { %1606 = vsyncadd (%p1243_p10), %s982_s12, 4294967168  ;;  %s992_s25 = scalar_lea.sflag [#allocation19], %s981_s30 }
 0x497   : > { %1608 = dma.done.wait (%p1243_p10), %s992_s25, 128  }
 0x498   : > { %1610 = vsyncadd (%p1243_p10), %s992_s25, 4294967168  ;;  %s36_s14 = sadd.s32 1, %s1633_s14   ;;  %s2048_s28 = sld [smem:[#allocation28_spill]] }
 0x499   : > { %p33_p11 = scmp.ge.s32.totalorder %s36_s14, 4   ;;  %s2049_s11 = sld [smem:[#allocation33_spill]] }
 0x49a   : > { %s2050_s7 = sld [smem:[#allocation31_spill]]  ;;  %s2051_s30 = smov %s1617_s10 }
 0x49b   : > { %s2053_s12 = smov %s1629_s13 }
 0x49c   :  { %35 = sbr.rel (!%p33_p11) target bundleno = 19 (0x13), region = 171 }
 0x49e   : > { %s2052_s10 = smov %s2048_s28 }
 0x4a0   : > { %s2054_s13 = smov %s2050_s7 }
 0x4a1   :  { %998 = vsyncpa [#allocation7], 1 }
 0x4a2   :  { %1000 = vsyncpa [#allocation7 + $0x1], 1 }
 0x4a3   :  { %1001 = vsyncpa [#allocation10], 1 }
 0x4a4   :  { %1003 = vsyncpa [#allocation10 + $0x1], 1 }
 0x4a5   :  { %1004 = vsyncpa [#allocation13], 1 }
 0x4a6   :  { %1006 = vsyncpa [#allocation13 + $0x1], 1 }
 0x4a7   :  { %1007 = vsyncpa [#allocation16], 1 }
 0x4a8   :  { %1008 = vsyncpa [#allocation8], 1 }
 0x4a9   :  { %1010 = vsyncpa [#allocation8 + $0x1], 1 }
 0x4aa   :  { %1011 = vsyncpa [#allocation19], 1 }
 0x4ab   :  { %1013 = vsyncpa [#allocation19 + $0x1], 1 }

</bundles_post_ra>
